<compile_context>
chip_gen: v7x
topology: tpu7x:2x2x1
jax: 0.10.0
libtpu: 0.0.40
codegen_flags: <defaults>
</compile_context>

<pallas_src>
import math

import numpy as np
import jax
import jax.numpy as jnp
from jax.experimental import pallas as pl
from jax.experimental.pallas import tpu as pltpu

NUM_BINS = 20
NBS = 4  # blocks per side (sqrt(16))


def make_dcp_config(alpha_h, alpha_d, thresh_FOD_h, thresh_FOD_d,
                    thresh_mask_h, thresh_mask_d):
    rgb_from_hed = np.array([[0.65, 0.70, 0.29],
                             [0.07, 0.99, 0.11],
                             [0.27, 0.57, 0.78]], dtype=np.float64)
    hed_from_rgb = np.linalg.inv(rgb_from_hed)
    coeffs = np.array([0.2125, 0.7154, 0.0721], dtype=np.float64)

    comb_h = tuple(float(rgb_from_hed[0, c]) for c in range(3))
    comb_d = tuple(float(rgb_from_hed[2, c]) for c in range(3))
    # Safety for the removed clip(grey, 0, 1): with non-negative combine
    # coefficients and sum(coeffs) == 1, grey = sum_c coeffs[c]*exp(-s*comb[c])
    # is always in (0, 1], so the clamp in the torch reference is a no-op.
    assert all(c >= 0.0 for c in comb_h + comb_d)
    assert abs(float(coeffs.sum()) - 1.0) < 1e-6

    return dict(
        # column 0 (H) / column 2 (D) of hed_from_rgb (stain separation)
        sep_h=tuple(float(hed_from_rgb[i, 0]) for i in range(3)),
        sep_d=tuple(float(hed_from_rgb[i, 2]) for i in range(3)),
        # row 0 (H) / row 2 (D) of rgb_from_hed (stain recombination)
        comb_h=comb_h, comb_d=comb_d,
        coeffs=tuple(float(c) for c in coeffs),
        alpha_h=float(alpha_h), alpha_d=float(alpha_d),
        calib_h=float(10.0 ** (-math.e ** (1.0 / alpha_h))),
        calib_d=float(10.0 ** (-math.e ** (1.0 / alpha_d))),
        thresh_FOD_h=float(thresh_FOD_h), thresh_FOD_d=float(thresh_FOD_d),
        thresh_mask_h=float(thresh_mask_h), thresh_mask_d=float(thresh_mask_d),
    )


def _pow_fast(x, alpha):
    """x**alpha with small-integer alpha special-cased to multiplies (EUP saver)."""
    ai = int(round(alpha))
    if abs(alpha - ai) < 1e-9 and 1 <= ai <= 4:
        y = x
        for _ in range(ai - 1):
            y = y * x
        return y
    return jnp.power(x, alpha)


def _make_od_kernel(cfg, TH, W):
    inv_ln10 = 1.0 / math.log(10.0)
    inv_bw = NUM_BINS / math.e          # 1 / histogram bucket width
    coeffs = cfg["coeffs"]

    def kernel(img_ref, sh_ref, swt_ref,
               blk_h_ref, hist_h_ref, mask_h_ref,
               blk_d_ref, hist_d_ref, mask_d_ref):
        t = pl.program_id(1)

        # Zero the resident accumulators on the first H-tile of each image.
        @pl.when(t == 0)
        def _init():
            blk_h_ref[...] = jnp.zeros_like(blk_h_ref)
            hist_h_ref[...] = jnp.zeros_like(hist_h_ref)
            blk_d_ref[...] = jnp.zeros_like(blk_d_ref)
            hist_d_ref[...] = jnp.zeros_like(hist_d_ref)

        img = img_ref[0]                                   # (3, TH, W) native dtype
        r = jnp.maximum(img[0].astype(jnp.float32), 1e-6)
        g = jnp.maximum(img[1].astype(jnp.float32), 1e-6)
        b = jnp.maximum(img[2].astype(jnp.float32), 1e-6)
        lr, lg, lb = jnp.log(r), jnp.log(g), jnp.log(b)

        # separate_stains with the /log_adjust and *(-log_adjust) constants
        # folded away:  s = relu(-(ln(rgb) . hed_from_rgb[:, col]))
        mh, md = cfg["sep_h"], cfg["sep_d"]
        s_h = jnp.maximum(-(lr * mh[0] + lg * mh[1] + lb * mh[2]), 0.0)
        s_d = jnp.maximum(-(lr * md[0] + lg * md[1] + lb * md[2]), 0.0)

        # Precomputed 4x4 block-indicator matrices (constant operands).
        Sh = sh_ref[0]                                     # (4, TH)
        SwT = swt_ref[...]                                 # (W, 4)

        def do_channel(s, comb, calib, alpha, t_fod, t_mask,
                       blk_ref, hist_ref, mask_ref):
            # combine_stains (single stain channel) fused with rgb2gray.
            # grey in (0,1] by construction -> clip(grey,0,1) elided.
            grey = (coeffs[0] * jnp.exp(-s * comb[0])
                    + coeffs[1] * jnp.exp(-s * comb[1])
                    + coeffs[2] * jnp.exp(-s * comb[2]))
            fod = jnp.maximum(-jnp.log(grey + calib) * inv_ln10, 0.0)
            fod = _pow_fast(fod, alpha)
            fod_relu = jnp.where(fod < t_fod, 0.0, fod)

            # Binary mask; the (fod > 0) term is redundant iff t_mask > 0.
            if t_mask > 0.0:
                cond = fod >= t_mask
            else:
                cond = (fod >= t_mask) & (fod > 0.0)
            mask_ref[0] = cond.astype(mask_ref.dtype)

            # 16 block sums on the MXU:  Sh @ fod_relu @ SwT  -> (4, 4)
            a = jnp.dot(Sh, fod_relu, preferred_element_type=jnp.float32)
            blk = jnp.dot(a, SwT, preferred_element_type=jnp.float32)
            blk_ref[...] = blk_ref[...] + blk[None]

            # 20-bin FOD-weighted histogram of (pre-threshold) fod values:
            # int32 bin index once, per-bin sublane-only column sums, then a
            # single small cross-lane reduce per tile.
            idx = jnp.minimum(fod * inv_bw, float(NUM_BINS - 1)).astype(jnp.int32)
            cols = [jnp.sum(jnp.where(idx == j, fod, 0.0),
                            axis=0, keepdims=True)          # (1, W)
                    for j in range(NUM_BINS)]
            colhist = jnp.concatenate(cols, axis=0)          # (20, W)
            hpart = jnp.sum(colhist, axis=1)                 # (20,)
            hist_ref[...] = hist_ref[...] + hpart[None, None, :]

        do_channel(s_h, cfg["comb_h"], cfg["calib_h"], cfg["alpha_h"],
                   cfg["thresh_FOD_h"], cfg["thresh_mask_h"],
                   blk_h_ref, hist_h_ref, mask_h_ref)
        do_channel(s_d, cfg["comb_d"], cfg["calib_d"], cfg["alpha_d"],
                   cfg["thresh_FOD_d"], cfg["thresh_mask_d"],
                   blk_d_ref, hist_d_ref, mask_d_ref)

    return kernel


def _sublane_multiple(dtype):
    return {4: 8, 2: 16, 1: 32}.get(jnp.dtype(dtype).itemsize, 8)


def _choose_tile_rows(H, W, max_pixels, sub):
    """Largest legal H-tile (divides H, %sub==0 or ==H) within a pixel budget."""
    valid = [d for d in range(1, H + 1)
             if H % d == 0 and (d == H or d % sub == 0)]
    fitting = [d for d in valid if d * W <= max_pixels]
    return max(fitting) if fitting else min(valid)


def compute_od_pallas(images, cfg, *, tile_rows=None,
                      max_tile_pixels=512 * 1024,
                      vmem_limit_bytes=48 * 1024 * 1024,
                      mask_dtype=jnp.float32):
    """images: (N, 3, H, W), any float dtype.  Returns per stain channel (h, d):
       block sums (N,4,4), histogram sums (N,20), binary mask (N,H,W)."""
    N, C, H, W = images.shape
    assert C == 3
    assert H % NBS == 0 and W % NBS == 0, "H and W must be divisible by 4"

    sub = max(_sublane_multiple(images.dtype), _sublane_multiple(mask_dtype))
    TH = tile_rows if tile_rows is not None else _choose_tile_rows(H, W, max_tile_pixels, sub)
    assert H % TH == 0 and (TH == H or TH % sub == 0), \
        f"tile_rows={TH} must divide H={H} and be a multiple of {sub} (or equal H)"
    n_t = H // TH
    Hb, Wb = H // NBS, W // NBS

    # Host-side block-indicator matrices (tiny constant operands).
    rows = np.arange(H)
    sh_all = (rows[None, :] // Hb == np.arange(NBS)[:, None]).astype(np.float32)  # (4, H)
    sh_all = sh_all.reshape(NBS, n_t, TH).transpose(1, 0, 2)                      # (n_t, 4, TH)
    colsw = np.arange(W)
    swt = (colsw[:, None] // Wb == np.arange(NBS)[None, :]).astype(np.float32)    # (W, 4)

    kernel = _make_od_kernel(cfg, TH, W)

    out_shape = (
        jax.ShapeDtypeStruct((N, NBS, NBS), jnp.float32),     # block_h
        jax.ShapeDtypeStruct((N, 1, NUM_BINS), jnp.float32),  # histo_h
        jax.ShapeDtypeStruct((N, H, W), mask_dtype),          # mask_h
        jax.ShapeDtypeStruct((N, NBS, NBS), jnp.float32),     # block_d
        jax.ShapeDtypeStruct((N, 1, NUM_BINS), jnp.float32),  # histo_d
        jax.ShapeDtypeStruct((N, H, W), mask_dtype),          # mask_d
    )
    small_blk = pl.BlockSpec((1, NBS, NBS), lambda b, t: (b, 0, 0))
    small_hist = pl.BlockSpec((1, 1, NUM_BINS), lambda b, t: (b, 0, 0))
    mask_spec = pl.BlockSpec((1, TH, W), lambda b, t: (b, t, 0))

    outs = pl.pallas_call(
        kernel,
        out_shape=out_shape,
        grid=(N, n_t),
        in_specs=[pl.BlockSpec((1, 3, TH, W), lambda b, t: (b, 0, t, 0)),
                  pl.BlockSpec((1, NBS, TH), lambda b, t: (t, 0, 0)),
                  pl.BlockSpec((W, NBS), lambda b, t: (0, 0))],
        out_specs=(small_blk, small_hist, mask_spec,
                   small_blk, small_hist, mask_spec),
        compiler_params=pltpu.CompilerParams(
            dimension_semantics=("parallel", "arbitrary"),
            vmem_limit_bytes=vmem_limit_bytes),
    )(images, jnp.asarray(sh_all), jnp.asarray(swt))

    block_h, histo_h, mask_h, block_d, histo_d, mask_d = outs
    return (block_h, histo_h[:, 0, :], mask_h,
            block_d, histo_d[:, 0, :], mask_d)


def dcp_loss(inputs, targets, cfg, *, tile_rows=None, mask_dtype=jnp.float32):
    """Reproduces DCP_LOSS.forward. inputs/targets: (B, 3, H, W)."""
    B, C, H, W = inputs.shape
    HW = float(H * W)

    # Two independent pallas_calls: no concat round-trip, no mask slicing.
    (i_blk_h, i_his_h, i_msk_h,
     i_blk_d, i_his_d, i_msk_d) = compute_od_pallas(
        inputs, cfg, tile_rows=tile_rows, mask_dtype=mask_dtype)
    (t_blk_h, t_his_h, t_msk_h,
     t_blk_d, t_his_d, t_msk_d) = compute_od_pallas(
        targets, cfg, tile_rows=tile_rows, mask_dtype=mask_dtype)

    # avg(FOD_relu) == sum of the 16 block sums (blocks partition the image
    # since H % 4 == 0 and W % 4 == 0; asserted in compute_od_pallas).
    def avg(blk):
        return jnp.sum(blk.reshape(blk.shape[0], -1), axis=1)

    i_avg_h, t_avg_h = avg(i_blk_h), avg(t_blk_h)
    i_avg_d, t_avg_d = avg(i_blk_d), avg(t_blk_d)

    def branch_loss(i_avg, i_blk, i_his, t_avg, t_blk, t_his):
        dcp_avg = (i_avg - t_avg) ** 2 / (HW ** 2)                        # (B,)
        dcp_his = jnp.sum((i_his / HW - t_his / HW) ** 2, axis=1) / B     # (B,)
        dcp_blk = jnp.mean((i_blk / (HW / 16.0) - t_blk / (HW / 16.0)) ** 2)
        diff = i_avg - t_avg
        cond = (diff >= t_avg * -0.4) & (diff <= t_avg * 0.4)
        return jnp.sum(jnp.where(cond, dcp_his, dcp_avg + dcp_his)) + dcp_blk

    loss = (branch_loss(i_avg_h, i_blk_h, i_his_h, t_avg_h, t_blk_h, t_his_h)
            + branch_loss(i_avg_d, i_blk_d, i_his_d, t_avg_d, t_blk_d, t_his_d))
    return loss, i_msk_h, t_msk_h, i_msk_d, t_msk_d


if __name__ == "__main__":
    cfg = make_dcp_config(alpha_h=2.0, alpha_d=2.0,
                          thresh_FOD_h=0.05, thresh_FOD_d=0.05,
                          thresh_mask_h=0.30, thresh_mask_d=0.30)

    B, C, H, W = 2, 3, 16, 16
    key = jax.random.PRNGKey(0)
    k1, k2 = jax.random.split(key)
    inputs = jax.random.uniform(k1, (B, C, H, W), dtype=jnp.float32)
    targets = jax.random.uniform(k2, (B, C, H, W), dtype=jnp.float32)

    # tile_rows=8 forces two H-tiles so the multi-tile accumulation path
    # (pl.when init + resident-output accumulate) is exercised at demo size.
    loss, mi_h, mt_h, mi_d, mt_d = dcp_loss(inputs, targets, cfg, tile_rows=8)
    jax.block_until_ready((loss, mi_h, mt_h, mi_d, mt_d))
    print("KERNEL_OK")
</pallas_src>

<mosaic_0001>
module attributes {stable_mosaic.version = 11 : i64} {
  func.func @kernel(%arg0: i32, %arg1: i32, %arg2: memref<1x3x8x16xf32, #tpu.memory_space<vmem>>, %arg3: memref<1x4x8xf32, #tpu.memory_space<vmem>>, %arg4: memref<16x4xf32, #tpu.memory_space<vmem>>, %arg5: memref<1x4x4xf32, #tpu.memory_space<vmem>>, %arg6: memref<1x1x20xf32, #tpu.memory_space<vmem>>, %arg7: memref<1x8x16xf32, #tpu.memory_space<vmem>>, %arg8: memref<1x4x4xf32, #tpu.memory_space<vmem>>, %arg9: memref<1x1x20xf32, #tpu.memory_space<vmem>>, %arg10: memref<1x8x16xf32, #tpu.memory_space<vmem>>) attributes {dimension_semantics = [#tpu.dimension_semantics<parallel>, #tpu.dimension_semantics<arbitrary>], iteration_bounds = array<i64: 2, 2>, scalar_prefetch = 0 : i64, scratch_operands = 0 : i64, tpu.core_type = #tpu.core_type<tc>, window_params = [{transform_indices = @transform_0, window_bounds = array<i64: 1, 3, 8, 16>}, {transform_indices = @transform_1, window_bounds = array<i64: 1, 4, 8>}, {pipeline_mode = #tpu.pipeline_mode<synchronous>, transform_indices = @transform_2, window_bounds = array<i64: 16, 4>}, {transform_indices = @transform_3, window_bounds = array<i64: 1, 4, 4>}, {transform_indices = @transform_4, window_bounds = array<i64: 1, 1, 20>}, {transform_indices = @transform_5, window_bounds = array<i64: 1, 8, 16>}, {transform_indices = @transform_6, window_bounds = array<i64: 1, 4, 4>}, {transform_indices = @transform_7, window_bounds = array<i64: 1, 1, 20>}, {transform_indices = @transform_8, window_bounds = array<i64: 1, 8, 16>}]} {
    %c0_i32 = arith.constant 0 : i32
    %0 = arith.cmpi eq, %arg1, %c0_i32 : i32
    %1 = arith.extui %0 : i1 to i32
    %c0_i32_0 = arith.constant 0 : i32
    %2 = arith.cmpi ne, %1, %c0_i32_0 : i32
    scf.if %2 {
      %cst_194 = arith.constant 0.000000e+00 : f32
      %413 = vector.broadcast %cst_194 : f32 to vector<1x4x4xf32>
      %c0_195 = arith.constant 0 : index
      %c0_196 = arith.constant 0 : index
      %c0_197 = arith.constant 0 : index
      %414 = vector.load %arg5[%c0_195, %c0_196, %c0_197] : memref<1x4x4xf32, #tpu.memory_space<vmem>>, vector<1x4x4xf32>
      tpu.vector_store %arg5[%c0_195, %c0_196, %c0_197], %413 {strides = array<i32>} : memref<1x4x4xf32, #tpu.memory_space<vmem>>, vector<1x4x4xf32>,
      %cst_198 = arith.constant 0.000000e+00 : f32
      %415 = vector.broadcast %cst_198 : f32 to vector<1x1x20xf32>
      %c0_199 = arith.constant 0 : index
      %c0_200 = arith.constant 0 : index
      %c0_201 = arith.constant 0 : index
      %416 = vector.load %arg6[%c0_199, %c0_200, %c0_201] : memref<1x1x20xf32, #tpu.memory_space<vmem>>, vector<1x1x20xf32>
      tpu.vector_store %arg6[%c0_199, %c0_200, %c0_201], %415 {strides = array<i32>} : memref<1x1x20xf32, #tpu.memory_space<vmem>>, vector<1x1x20xf32>,
      %cst_202 = arith.constant 0.000000e+00 : f32
      %417 = vector.broadcast %cst_202 : f32 to vector<1x4x4xf32>
      %c0_203 = arith.constant 0 : index
      %c0_204 = arith.constant 0 : index
      %c0_205 = arith.constant 0 : index
      %418 = vector.load %arg8[%c0_203, %c0_204, %c0_205] : memref<1x4x4xf32, #tpu.memory_space<vmem>>, vector<1x4x4xf32>
      tpu.vector_store %arg8[%c0_203, %c0_204, %c0_205], %417 {strides = array<i32>} : memref<1x4x4xf32, #tpu.memory_space<vmem>>, vector<1x4x4xf32>,
      %cst_206 = arith.constant 0.000000e+00 : f32
      %419 = vector.broadcast %cst_206 : f32 to vector<1x1x20xf32>
      %c0_207 = arith.constant 0 : index
      %c0_208 = arith.constant 0 : index
      %c0_209 = arith.constant 0 : index
      %420 = vector.load %arg9[%c0_207, %c0_208, %c0_209] : memref<1x1x20xf32, #tpu.memory_space<vmem>>, vector<1x1x20xf32>
      tpu.vector_store %arg9[%c0_207, %c0_208, %c0_209], %419 {strides = array<i32>} : memref<1x1x20xf32, #tpu.memory_space<vmem>>, vector<1x1x20xf32>,
    } else {
    }
    %c0 = arith.constant 0 : index
    %c0_1 = arith.constant 0 : index
    %c0_2 = arith.constant 0 : index
    %c0_3 = arith.constant 0 : index
    %3 = vector.load %arg2[%c0, %c0_1, %c0_2, %c0_3] : memref<1x3x8x16xf32, #tpu.memory_space<vmem>>, vector<1x3x8x16xf32>
    %4 = vector.shape_cast %3 : vector<1x3x8x16xf32> to vector<3x8x16xf32>
    %5 = vector.extract_strided_slice %4 {offsets = [0, 0, 0], sizes = [1, 8, 16], strides = [1, 1, 1]} : vector<3x8x16xf32> to vector<1x8x16xf32>
    %6 = vector.shape_cast %5 : vector<1x8x16xf32> to vector<8x16xf32>
    %cst = arith.constant 9.99999997E-7 : f32
    %7 = vector.broadcast %cst : f32 to vector<8x16xf32>
    %8 = arith.maximumf %6, %7 : vector<8x16xf32>
    %9 = vector.extract_strided_slice %4 {offsets = [1, 0, 0], sizes = [1, 8, 16], strides = [1, 1, 1]} : vector<3x8x16xf32> to vector<1x8x16xf32>
    %10 = vector.shape_cast %9 : vector<1x8x16xf32> to vector<8x16xf32>
    %cst_4 = arith.constant 9.99999997E-7 : f32
    %11 = vector.broadcast %cst_4 : f32 to vector<8x16xf32>
    %12 = arith.maximumf %10, %11 : vector<8x16xf32>
    %13 = vector.extract_strided_slice %4 {offsets = [2, 0, 0], sizes = [1, 8, 16], strides = [1, 1, 1]} : vector<3x8x16xf32> to vector<1x8x16xf32>
    %14 = vector.shape_cast %13 : vector<1x8x16xf32> to vector<8x16xf32>
    %cst_5 = arith.constant 9.99999997E-7 : f32
    %15 = vector.broadcast %cst_5 : f32 to vector<8x16xf32>
    %16 = arith.maximumf %14, %15 : vector<8x16xf32>
    %17 = math.log %8 : vector<8x16xf32>
    %18 = math.log %12 : vector<8x16xf32>
    %19 = math.log %16 : vector<8x16xf32>
    %cst_6 = arith.constant 1.87798274 : f32
    %20 = vector.broadcast %cst_6 : f32 to vector<8x16xf32>
    %21 = arith.mulf %17, %20 : vector<8x16xf32>
    %cst_7 = arith.constant -0.0659080595 : f32
    %22 = vector.broadcast %cst_7 : f32 to vector<8x16xf32>
    %23 = arith.mulf %18, %22 : vector<8x16xf32>
    %24 = arith.addf %21, %23 : vector<8x16xf32>
    %cst_8 = arith.constant -0.601907372 : f32
    %25 = vector.broadcast %cst_8 : f32 to vector<8x16xf32>
    %26 = arith.mulf %19, %25 : vector<8x16xf32>
    %27 = arith.addf %24, %26 : vector<8x16xf32>
    %cst_9 = arith.constant 0.000000e+00 : f32
    %28 = vector.broadcast %cst_9 : f32 to vector<8x16xf32>
    %29 = arith.subf %28, %27 : vector<8x16xf32>
    %cst_10 = arith.constant 0.000000e+00 : f32
    %30 = vector.broadcast %cst_10 : f32 to vector<8x16xf32>
    %31 = arith.maximumf %29, %30 : vector<8x16xf32>
    %cst_11 = arith.constant -0.556115806 : f32
    %32 = vector.broadcast %cst_11 : f32 to vector<8x16xf32>
    %33 = arith.mulf %17, %32 : vector<8x16xf32>
    %cst_12 = arith.constant -0.135521799 : f32
    %34 = vector.broadcast %cst_12 : f32 to vector<8x16xf32>
    %35 = arith.mulf %18, %34 : vector<8x16xf32>
    %36 = arith.addf %33, %35 : vector<8x16xf32>
    %cst_13 = arith.constant 1.57358801 : f32
    %37 = vector.broadcast %cst_13 : f32 to vector<8x16xf32>
    %38 = arith.mulf %19, %37 : vector<8x16xf32>
    %39 = arith.addf %36, %38 : vector<8x16xf32>
    %cst_14 = arith.constant 0.000000e+00 : f32
    %40 = vector.broadcast %cst_14 : f32 to vector<8x16xf32>
    %41 = arith.subf %40, %39 : vector<8x16xf32>
    %cst_15 = arith.constant 0.000000e+00 : f32
    %42 = vector.broadcast %cst_15 : f32 to vector<8x16xf32>
    %43 = arith.maximumf %41, %42 : vector<8x16xf32>
    %c0_16 = arith.constant 0 : index
    %c0_17 = arith.constant 0 : index
    %c0_18 = arith.constant 0 : index
    %44 = vector.load %arg3[%c0_16, %c0_17, %c0_18] : memref<1x4x8xf32, #tpu.memory_space<vmem>>, vector<1x4x8xf32>
    %45 = vector.shape_cast %44 : vector<1x4x8xf32> to vector<4x8xf32>
    %c0_19 = arith.constant 0 : index
    %c0_20 = arith.constant 0 : index
    %46 = vector.load %arg4[%c0_19, %c0_20] : memref<16x4xf32, #tpu.memory_space<vmem>>, vector<16x4xf32>
    %cst_21 = arith.constant 0.000000e+00 : f32
    %47 = vector.broadcast %cst_21 : f32 to vector<8x16xf32>
    %48 = arith.subf %47, %31 : vector<8x16xf32>
    %cst_22 = arith.constant 6.500000e-01 : f32
    %49 = vector.broadcast %cst_22 : f32 to vector<8x16xf32>
    %50 = arith.mulf %48, %49 : vector<8x16xf32>
    %51 = math.exp %50 : vector<8x16xf32>
    %cst_23 = arith.constant 2.125000e-01 : f32
    %52 = vector.broadcast %cst_23 : f32 to vector<8x16xf32>
    %53 = arith.mulf %52, %51 : vector<8x16xf32>
    %cst_24 = arith.constant 0.000000e+00 : f32
    %54 = vector.broadcast %cst_24 : f32 to vector<8x16xf32>
    %55 = arith.subf %54, %31 : vector<8x16xf32>
    %cst_25 = arith.constant 0.699999988 : f32
    %56 = vector.broadcast %cst_25 : f32 to vector<8x16xf32>
    %57 = arith.mulf %55, %56 : vector<8x16xf32>
    %58 = math.exp %57 : vector<8x16xf32>
    %cst_26 = arith.constant 7.154000e-01 : f32
    %59 = vector.broadcast %cst_26 : f32 to vector<8x16xf32>
    %60 = arith.mulf %59, %58 : vector<8x16xf32>
    %61 = arith.addf %53, %60 : vector<8x16xf32>
    %cst_27 = arith.constant 0.000000e+00 : f32
    %62 = vector.broadcast %cst_27 : f32 to vector<8x16xf32>
    %63 = arith.subf %62, %31 : vector<8x16xf32>
    %cst_28 = arith.constant 2.900000e-01 : f32
    %64 = vector.broadcast %cst_28 : f32 to vector<8x16xf32>
    %65 = arith.mulf %63, %64 : vector<8x16xf32>
    %66 = math.exp %65 : vector<8x16xf32>
    %cst_29 = arith.constant 7.210000e-02 : f32
    %67 = vector.broadcast %cst_29 : f32 to vector<8x16xf32>
    %68 = arith.mulf %67, %66 : vector<8x16xf32>
    %69 = arith.addf %61, %68 : vector<8x16xf32>
    %cst_30 = arith.constant 0.0224532243 : f32
    %70 = vector.broadcast %cst_30 : f32 to vector<8x16xf32>
    %71 = arith.addf %69, %70 : vector<8x16xf32>
    %72 = math.log %71 : vector<8x16xf32>
    %cst_31 = arith.constant 0.000000e+00 : f32
    %73 = vector.broadcast %cst_31 : f32 to vector<8x16xf32>
    %74 = arith.subf %73, %72 : vector<8x16xf32>
    %cst_32 = arith.constant 0.434294492 : f32
    %75 = vector.broadcast %cst_32 : f32 to vector<8x16xf32>
    %76 = arith.mulf %74, %75 : vector<8x16xf32>
    %cst_33 = arith.constant 0.000000e+00 : f32
    %77 = vector.broadcast %cst_33 : f32 to vector<8x16xf32>
    %78 = arith.maximumf %76, %77 : vector<8x16xf32>
    %79 = arith.mulf %78, %78 : vector<8x16xf32>
    %cst_34 = arith.constant 5.000000e-02 : f32
    %80 = vector.broadcast %cst_34 : f32 to vector<8x16xf32>
    %81 = arith.cmpf olt, %79, %80 : vector<8x16xf32>
    %cst_35 = arith.constant 0.000000e+00 : f32
    %82 = vector.broadcast %cst_35 : f32 to vector<8x16xf32>
    %83 = arith.select %81, %82, %79 : vector<8x16xi1>, vector<8x16xf32>
    %cst_36 = arith.constant 3.000000e-01 : f32
    %84 = vector.broadcast %cst_36 : f32 to vector<8x16xf32>
    %85 = arith.cmpf oge, %79, %84 : vector<8x16xf32>
    %86 = arith.extui %85 : vector<8x16xi1> to vector<8x16xi32>
    %87 = arith.sitofp %86 : vector<8x16xi32> to vector<8x16xf32>
    %c0_37 = arith.constant 0 : index
    %c0_38 = arith.constant 0 : index
    %c0_39 = arith.constant 0 : index
    %88 = vector.load %arg7[%c0_37, %c0_38, %c0_39] : memref<1x8x16xf32, #tpu.memory_space<vmem>>, vector<1x8x16xf32>
    %89 = vector.shape_cast %88 : vector<1x8x16xf32> to vector<8x16xf32>
    %90 = vector.shape_cast %87 : vector<8x16xf32> to vector<1x8x16xf32>
    tpu.vector_store %arg7[%c0_37, %c0_38, %c0_39], %90 {strides = array<i32>} : memref<1x8x16xf32, #tpu.memory_space<vmem>>, vector<1x8x16xf32>,
    %cst_40 = arith.constant dense<0.000000e+00> : vector<4x16xf32>
    %91 = tpu.matmul %45, %83, %cst_40 {dimension_numbers = #tpu.dot_dimension_numbers<[1], [0], [0], [1], [0, 0, 1, 1], [], []>} : vector<4x8xf32>, vector<8x16xf32>, vector<4x16xf32> -> vector<4x16xf32>
    %cst_41 = arith.constant dense<0.000000e+00> : vector<4x4xf32>
    %92 = tpu.matmul %91, %46, %cst_41 {dimension_numbers = #tpu.dot_dimension_numbers<[1], [0], [0], [1], [0, 0, 1, 1], [], []>} : vector<4x16xf32>, vector<16x4xf32>, vector<4x4xf32> -> vector<4x4xf32>
    %c0_42 = arith.constant 0 : index
    %c0_43 = arith.constant 0 : index
    %c0_44 = arith.constant 0 : index
    %93 = vector.load %arg5[%c0_42, %c0_43, %c0_44] : memref<1x4x4xf32, #tpu.memory_space<vmem>>, vector<1x4x4xf32>
    %94 = vector.shape_cast %92 : vector<4x4xf32> to vector<1x4x4xf32>
    %95 = arith.addf %93, %94 : vector<1x4x4xf32>
    %c0_45 = arith.constant 0 : index
    %c0_46 = arith.constant 0 : index
    %c0_47 = arith.constant 0 : index
    %96 = vector.load %arg5[%c0_45, %c0_46, %c0_47] : memref<1x4x4xf32, #tpu.memory_space<vmem>>, vector<1x4x4xf32>
    tpu.vector_store %arg5[%c0_45, %c0_46, %c0_47], %95 {strides = array<i32>} : memref<1x4x4xf32, #tpu.memory_space<vmem>>, vector<1x4x4xf32>,
    %cst_48 = arith.constant 7.35758876 : f32
    %97 = vector.broadcast %cst_48 : f32 to vector<8x16xf32>
    %98 = arith.mulf %79, %97 : vector<8x16xf32>
    %cst_49 = arith.constant 1.900000e+01 : f32
    %99 = vector.broadcast %cst_49 : f32 to vector<8x16xf32>
    %100 = arith.minimumf %98, %99 : vector<8x16xf32>
    %101 = arith.fptosi %100 : vector<8x16xf32> to vector<8x16xi32>
    %c0_i32_50 = arith.constant 0 : i32
    %102 = vector.broadcast %c0_i32_50 : i32 to vector<8x16xi32>
    %103 = arith.cmpi eq, %101, %102 : vector<8x16xi32>
    %cst_51 = arith.constant 0.000000e+00 : f32
    %104 = vector.broadcast %cst_51 : f32 to vector<8x16xf32>
    %105 = arith.select %103, %79, %104 : vector<8x16xi1>, vector<8x16xf32>
    %cst_52 = arith.constant dense<0.000000e+00> : vector<16xf32>
    %106 = vector.multi_reduction <add>, %105, %cst_52 [0] : vector<8x16xf32> to vector<16xf32>
    %107 = vector.shape_cast %106 : vector<16xf32> to vector<1x16xf32>
    %c1_i32 = arith.constant 1 : i32
    %108 = vector.broadcast %c1_i32 : i32 to vector<8x16xi32>
    %109 = arith.cmpi eq, %101, %108 : vector<8x16xi32>
    %cst_53 = arith.constant 0.000000e+00 : f32
    %110 = vector.broadcast %cst_53 : f32 to vector<8x16xf32>
    %111 = arith.select %109, %79, %110 : vector<8x16xi1>, vector<8x16xf32>
    %cst_54 = arith.constant dense<0.000000e+00> : vector<16xf32>
    %112 = vector.multi_reduction <add>, %111, %cst_54 [0] : vector<8x16xf32> to vector<16xf32>
    %113 = vector.shape_cast %112 : vector<16xf32> to vector<1x16xf32>
    %c2_i32 = arith.constant 2 : i32
    %114 = vector.broadcast %c2_i32 : i32 to vector<8x16xi32>
    %115 = arith.cmpi eq, %101, %114 : vector<8x16xi32>
    %cst_55 = arith.constant 0.000000e+00 : f32
    %116 = vector.broadcast %cst_55 : f32 to vector<8x16xf32>
    %117 = arith.select %115, %79, %116 : vector<8x16xi1>, vector<8x16xf32>
    %cst_56 = arith.constant dense<0.000000e+00> : vector<16xf32>
    %118 = vector.multi_reduction <add>, %117, %cst_56 [0] : vector<8x16xf32> to vector<16xf32>
    %119 = vector.shape_cast %118 : vector<16xf32> to vector<1x16xf32>
    %c3_i32 = arith.constant 3 : i32
    %120 = vector.broadcast %c3_i32 : i32 to vector<8x16xi32>
    %121 = arith.cmpi eq, %101, %120 : vector<8x16xi32>
    %cst_57 = arith.constant 0.000000e+00 : f32
    %122 = vector.broadcast %cst_57 : f32 to vector<8x16xf32>
    %123 = arith.select %121, %79, %122 : vector<8x16xi1>, vector<8x16xf32>
    %cst_58 = arith.constant dense<0.000000e+00> : vector<16xf32>
    %124 = vector.multi_reduction <add>, %123, %cst_58 [0] : vector<8x16xf32> to vector<16xf32>
    %125 = vector.shape_cast %124 : vector<16xf32> to vector<1x16xf32>
    %c4_i32 = arith.constant 4 : i32
    %126 = vector.broadcast %c4_i32 : i32 to vector<8x16xi32>
    %127 = arith.cmpi eq, %101, %126 : vector<8x16xi32>
    %cst_59 = arith.constant 0.000000e+00 : f32
    %128 = vector.broadcast %cst_59 : f32 to vector<8x16xf32>
    %129 = arith.select %127, %79, %128 : vector<8x16xi1>, vector<8x16xf32>
    %cst_60 = arith.constant dense<0.000000e+00> : vector<16xf32>
    %130 = vector.multi_reduction <add>, %129, %cst_60 [0] : vector<8x16xf32> to vector<16xf32>
    %131 = vector.shape_cast %130 : vector<16xf32> to vector<1x16xf32>
    %c5_i32 = arith.constant 5 : i32
    %132 = vector.broadcast %c5_i32 : i32 to vector<8x16xi32>
    %133 = arith.cmpi eq, %101, %132 : vector<8x16xi32>
    %cst_61 = arith.constant 0.000000e+00 : f32
    %134 = vector.broadcast %cst_61 : f32 to vector<8x16xf32>
    %135 = arith.select %133, %79, %134 : vector<8x16xi1>, vector<8x16xf32>
    %cst_62 = arith.constant dense<0.000000e+00> : vector<16xf32>
    %136 = vector.multi_reduction <add>, %135, %cst_62 [0] : vector<8x16xf32> to vector<16xf32>
    %137 = vector.shape_cast %136 : vector<16xf32> to vector<1x16xf32>
    %c6_i32 = arith.constant 6 : i32
    %138 = vector.broadcast %c6_i32 : i32 to vector<8x16xi32>
    %139 = arith.cmpi eq, %101, %138 : vector<8x16xi32>
    %cst_63 = arith.constant 0.000000e+00 : f32
    %140 = vector.broadcast %cst_63 : f32 to vector<8x16xf32>
    %141 = arith.select %139, %79, %140 : vector<8x16xi1>, vector<8x16xf32>
    %cst_64 = arith.constant dense<0.000000e+00> : vector<16xf32>
    %142 = vector.multi_reduction <add>, %141, %cst_64 [0] : vector<8x16xf32> to vector<16xf32>
    %143 = vector.shape_cast %142 : vector<16xf32> to vector<1x16xf32>
    %c7_i32 = arith.constant 7 : i32
    %144 = vector.broadcast %c7_i32 : i32 to vector<8x16xi32>
    %145 = arith.cmpi eq, %101, %144 : vector<8x16xi32>
    %cst_65 = arith.constant 0.000000e+00 : f32
    %146 = vector.broadcast %cst_65 : f32 to vector<8x16xf32>
    %147 = arith.select %145, %79, %146 : vector<8x16xi1>, vector<8x16xf32>
    %cst_66 = arith.constant dense<0.000000e+00> : vector<16xf32>
    %148 = vector.multi_reduction <add>, %147, %cst_66 [0] : vector<8x16xf32> to vector<16xf32>
    %149 = vector.shape_cast %148 : vector<16xf32> to vector<1x16xf32>
    %c8_i32 = arith.constant 8 : i32
    %150 = vector.broadcast %c8_i32 : i32 to vector<8x16xi32>
    %151 = arith.cmpi eq, %101, %150 : vector<8x16xi32>
    %cst_67 = arith.constant 0.000000e+00 : f32
    %152 = vector.broadcast %cst_67 : f32 to vector<8x16xf32>
    %153 = arith.select %151, %79, %152 : vector<8x16xi1>, vector<8x16xf32>
    %cst_68 = arith.constant dense<0.000000e+00> : vector<16xf32>
    %154 = vector.multi_reduction <add>, %153, %cst_68 [0] : vector<8x16xf32> to vector<16xf32>
    %155 = vector.shape_cast %154 : vector<16xf32> to vector<1x16xf32>
    %c9_i32 = arith.constant 9 : i32
    %156 = vector.broadcast %c9_i32 : i32 to vector<8x16xi32>
    %157 = arith.cmpi eq, %101, %156 : vector<8x16xi32>
    %cst_69 = arith.constant 0.000000e+00 : f32
    %158 = vector.broadcast %cst_69 : f32 to vector<8x16xf32>
    %159 = arith.select %157, %79, %158 : vector<8x16xi1>, vector<8x16xf32>
    %cst_70 = arith.constant dense<0.000000e+00> : vector<16xf32>
    %160 = vector.multi_reduction <add>, %159, %cst_70 [0] : vector<8x16xf32> to vector<16xf32>
    %161 = vector.shape_cast %160 : vector<16xf32> to vector<1x16xf32>
    %c10_i32 = arith.constant 10 : i32
    %162 = vector.broadcast %c10_i32 : i32 to vector<8x16xi32>
    %163 = arith.cmpi eq, %101, %162 : vector<8x16xi32>
    %cst_71 = arith.constant 0.000000e+00 : f32
    %164 = vector.broadcast %cst_71 : f32 to vector<8x16xf32>
    %165 = arith.select %163, %79, %164 : vector<8x16xi1>, vector<8x16xf32>
    %cst_72 = arith.constant dense<0.000000e+00> : vector<16xf32>
    %166 = vector.multi_reduction <add>, %165, %cst_72 [0] : vector<8x16xf32> to vector<16xf32>
    %167 = vector.shape_cast %166 : vector<16xf32> to vector<1x16xf32>
    %c11_i32 = arith.constant 11 : i32
    %168 = vector.broadcast %c11_i32 : i32 to vector<8x16xi32>
    %169 = arith.cmpi eq, %101, %168 : vector<8x16xi32>
    %cst_73 = arith.constant 0.000000e+00 : f32
    %170 = vector.broadcast %cst_73 : f32 to vector<8x16xf32>
    %171 = arith.select %169, %79, %170 : vector<8x16xi1>, vector<8x16xf32>
    %cst_74 = arith.constant dense<0.000000e+00> : vector<16xf32>
    %172 = vector.multi_reduction <add>, %171, %cst_74 [0] : vector<8x16xf32> to vector<16xf32>
    %173 = vector.shape_cast %172 : vector<16xf32> to vector<1x16xf32>
    %c12_i32 = arith.constant 12 : i32
    %174 = vector.broadcast %c12_i32 : i32 to vector<8x16xi32>
    %175 = arith.cmpi eq, %101, %174 : vector<8x16xi32>
    %cst_75 = arith.constant 0.000000e+00 : f32
    %176 = vector.broadcast %cst_75 : f32 to vector<8x16xf32>
    %177 = arith.select %175, %79, %176 : vector<8x16xi1>, vector<8x16xf32>
    %cst_76 = arith.constant dense<0.000000e+00> : vector<16xf32>
    %178 = vector.multi_reduction <add>, %177, %cst_76 [0] : vector<8x16xf32> to vector<16xf32>
    %179 = vector.shape_cast %178 : vector<16xf32> to vector<1x16xf32>
    %c13_i32 = arith.constant 13 : i32
    %180 = vector.broadcast %c13_i32 : i32 to vector<8x16xi32>
    %181 = arith.cmpi eq, %101, %180 : vector<8x16xi32>
    %cst_77 = arith.constant 0.000000e+00 : f32
    %182 = vector.broadcast %cst_77 : f32 to vector<8x16xf32>
    %183 = arith.select %181, %79, %182 : vector<8x16xi1>, vector<8x16xf32>
    %cst_78 = arith.constant dense<0.000000e+00> : vector<16xf32>
    %184 = vector.multi_reduction <add>, %183, %cst_78 [0] : vector<8x16xf32> to vector<16xf32>
    %185 = vector.shape_cast %184 : vector<16xf32> to vector<1x16xf32>
    %c14_i32 = arith.constant 14 : i32
    %186 = vector.broadcast %c14_i32 : i32 to vector<8x16xi32>
    %187 = arith.cmpi eq, %101, %186 : vector<8x16xi32>
    %cst_79 = arith.constant 0.000000e+00 : f32
    %188 = vector.broadcast %cst_79 : f32 to vector<8x16xf32>
    %189 = arith.select %187, %79, %188 : vector<8x16xi1>, vector<8x16xf32>
    %cst_80 = arith.constant dense<0.000000e+00> : vector<16xf32>
    %190 = vector.multi_reduction <add>, %189, %cst_80 [0] : vector<8x16xf32> to vector<16xf32>
    %191 = vector.shape_cast %190 : vector<16xf32> to vector<1x16xf32>
    %c15_i32 = arith.constant 15 : i32
    %192 = vector.broadcast %c15_i32 : i32 to vector<8x16xi32>
    %193 = arith.cmpi eq, %101, %192 : vector<8x16xi32>
    %cst_81 = arith.constant 0.000000e+00 : f32
    %194 = vector.broadcast %cst_81 : f32 to vector<8x16xf32>
    %195 = arith.select %193, %79, %194 : vector<8x16xi1>, vector<8x16xf32>
    %cst_82 = arith.constant dense<0.000000e+00> : vector<16xf32>
    %196 = vector.multi_reduction <add>, %195, %cst_82 [0] : vector<8x16xf32> to vector<16xf32>
    %197 = vector.shape_cast %196 : vector<16xf32> to vector<1x16xf32>
    %c16_i32 = arith.constant 16 : i32
    %198 = vector.broadcast %c16_i32 : i32 to vector<8x16xi32>
    %199 = arith.cmpi eq, %101, %198 : vector<8x16xi32>
    %cst_83 = arith.constant 0.000000e+00 : f32
    %200 = vector.broadcast %cst_83 : f32 to vector<8x16xf32>
    %201 = arith.select %199, %79, %200 : vector<8x16xi1>, vector<8x16xf32>
    %cst_84 = arith.constant dense<0.000000e+00> : vector<16xf32>
    %202 = vector.multi_reduction <add>, %201, %cst_84 [0] : vector<8x16xf32> to vector<16xf32>
    %203 = vector.shape_cast %202 : vector<16xf32> to vector<1x16xf32>
    %c17_i32 = arith.constant 17 : i32
    %204 = vector.broadcast %c17_i32 : i32 to vector<8x16xi32>
    %205 = arith.cmpi eq, %101, %204 : vector<8x16xi32>
    %cst_85 = arith.constant 0.000000e+00 : f32
    %206 = vector.broadcast %cst_85 : f32 to vector<8x16xf32>
    %207 = arith.select %205, %79, %206 : vector<8x16xi1>, vector<8x16xf32>
    %cst_86 = arith.constant dense<0.000000e+00> : vector<16xf32>
    %208 = vector.multi_reduction <add>, %207, %cst_86 [0] : vector<8x16xf32> to vector<16xf32>
    %209 = vector.shape_cast %208 : vector<16xf32> to vector<1x16xf32>
    %c18_i32 = arith.constant 18 : i32
    %210 = vector.broadcast %c18_i32 : i32 to vector<8x16xi32>
    %211 = arith.cmpi eq, %101, %210 : vector<8x16xi32>
    %cst_87 = arith.constant 0.000000e+00 : f32
    %212 = vector.broadcast %cst_87 : f32 to vector<8x16xf32>
    %213 = arith.select %211, %79, %212 : vector<8x16xi1>, vector<8x16xf32>
    %cst_88 = arith.constant dense<0.000000e+00> : vector<16xf32>
    %214 = vector.multi_reduction <add>, %213, %cst_88 [0] : vector<8x16xf32> to vector<16xf32>
    %215 = vector.shape_cast %214 : vector<16xf32> to vector<1x16xf32>
    %c19_i32 = arith.constant 19 : i32
    %216 = vector.broadcast %c19_i32 : i32 to vector<8x16xi32>
    %217 = arith.cmpi eq, %101, %216 : vector<8x16xi32>
    %cst_89 = arith.constant 0.000000e+00 : f32
    %218 = vector.broadcast %cst_89 : f32 to vector<8x16xf32>
    %219 = arith.select %217, %79, %218 : vector<8x16xi1>, vector<8x16xf32>
    %cst_90 = arith.constant dense<0.000000e+00> : vector<16xf32>
    %220 = vector.multi_reduction <add>, %219, %cst_90 [0] : vector<8x16xf32> to vector<16xf32>
    %221 = vector.shape_cast %220 : vector<16xf32> to vector<1x16xf32>
    %222 = tpu.concatenate %107, %113, %119, %125, %131, %137, %143, %149, %155, %161, %167, %173, %179, %185, %191, %197 in 0 : vector<1x16xf32>, vector<1x16xf32>, vector<1x16xf32>, vector<1x16xf32>, vector<1x16xf32>, vector<1x16xf32>, vector<1x16xf32>, vector<1x16xf32>, vector<1x16xf32>, vector<1x16xf32>, vector<1x16xf32>, vector<1x16xf32>, vector<1x16xf32>, vector<1x16xf32>, vector<1x16xf32>, vector<1x16xf32> -> vector<16x16xf32>
    %223 = tpu.concatenate %203, %209, %215, %221 in 0 : vector<1x16xf32>, vector<1x16xf32>, vector<1x16xf32>, vector<1x16xf32> -> vector<4x16xf32>
    %224 = tpu.concatenate %222, %223 in 0 : vector<16x16xf32>, vector<4x16xf32> -> vector<20x16xf32>
    %cst_91 = arith.constant dense<0.000000e+00> : vector<20xf32>
    %225 = vector.multi_reduction <add>, %224, %cst_91 [1] : vector<20x16xf32> to vector<20xf32>
    %c0_92 = arith.constant 0 : index
    %c0_93 = arith.constant 0 : index
    %c0_94 = arith.constant 0 : index
    %226 = vector.load %arg6[%c0_92, %c0_93, %c0_94] : memref<1x1x20xf32, #tpu.memory_space<vmem>>, vector<1x1x20xf32>
    %227 = vector.shape_cast %225 : vector<20xf32> to vector<1x1x20xf32>
    %228 = arith.addf %226, %227 : vector<1x1x20xf32>
    %c0_95 = arith.constant 0 : index
    %c0_96 = arith.constant 0 : index
    %c0_97 = arith.constant 0 : index
    %229 = vector.load %arg6[%c0_95, %c0_96, %c0_97] : memref<1x1x20xf32, #tpu.memory_space<vmem>>, vector<1x1x20xf32>
    tpu.vector_store %arg6[%c0_95, %c0_96, %c0_97], %228 {strides = array<i32>} : memref<1x1x20xf32, #tpu.memory_space<vmem>>, vector<1x1x20xf32>,
    %cst_98 = arith.constant 0.000000e+00 : f32
    %230 = vector.broadcast %cst_98 : f32 to vector<8x16xf32>
    %231 = arith.subf %230, %43 : vector<8x16xf32>
    %cst_99 = arith.constant 2.700000e-01 : f32
    %232 = vector.broadcast %cst_99 : f32 to vector<8x16xf32>
    %233 = arith.mulf %231, %232 : vector<8x16xf32>
    %234 = math.exp %233 : vector<8x16xf32>
    %cst_100 = arith.constant 2.125000e-01 : f32
    %235 = vector.broadcast %cst_100 : f32 to vector<8x16xf32>
    %236 = arith.mulf %235, %234 : vector<8x16xf32>
    %cst_101 = arith.constant 0.000000e+00 : f32
    %237 = vector.broadcast %cst_101 : f32 to vector<8x16xf32>
    %238 = arith.subf %237, %43 : vector<8x16xf32>
    %cst_102 = arith.constant 5.700000e-01 : f32
    %239 = vector.broadcast %cst_102 : f32 to vector<8x16xf32>
    %240 = arith.mulf %238, %239 : vector<8x16xf32>
    %241 = math.exp %240 : vector<8x16xf32>
    %cst_103 = arith.constant 7.154000e-01 : f32
    %242 = vector.broadcast %cst_103 : f32 to vector<8x16xf32>
    %243 = arith.mulf %242, %241 : vector<8x16xf32>
    %244 = arith.addf %236, %243 : vector<8x16xf32>
    %cst_104 = arith.constant 0.000000e+00 : f32
    %245 = vector.broadcast %cst_104 : f32 to vector<8x16xf32>
    %246 = arith.subf %245, %43 : vector<8x16xf32>
    %cst_105 = arith.constant 7.800000e-01 : f32
    %247 = vector.broadcast %cst_105 : f32 to vector<8x16xf32>
    %248 = arith.mulf %246, %247 : vector<8x16xf32>
    %249 = math.exp %248 : vector<8x16xf32>
    %cst_106 = arith.constant 7.210000e-02 : f32
    %250 = vector.broadcast %cst_106 : f32 to vector<8x16xf32>
    %251 = arith.mulf %250, %249 : vector<8x16xf32>
    %252 = arith.addf %244, %251 : vector<8x16xf32>
    %cst_107 = arith.constant 0.0224532243 : f32
    %253 = vector.broadcast %cst_107 : f32 to vector<8x16xf32>
    %254 = arith.addf %252, %253 : vector<8x16xf32>
    %255 = math.log %254 : vector<8x16xf32>
    %cst_108 = arith.constant 0.000000e+00 : f32
    %256 = vector.broadcast %cst_108 : f32 to vector<8x16xf32>
    %257 = arith.subf %256, %255 : vector<8x16xf32>
    %cst_109 = arith.constant 0.434294492 : f32
    %258 = vector.broadcast %cst_109 : f32 to vector<8x16xf32>
    %259 = arith.mulf %257, %258 : vector<8x16xf32>
    %cst_110 = arith.constant 0.000000e+00 : f32
    %260 = vector.broadcast %cst_110 : f32 to vector<8x16xf32>
    %261 = arith.maximumf %259, %260 : vector<8x16xf32>
    %262 = arith.mulf %261, %261 : vector<8x16xf32>
    %cst_111 = arith.constant 5.000000e-02 : f32
    %263 = vector.broadcast %cst_111 : f32 to vector<8x16xf32>
    %264 = arith.cmpf olt, %262, %263 : vector<8x16xf32>
    %cst_112 = arith.constant 0.000000e+00 : f32
    %265 = vector.broadcast %cst_112 : f32 to vector<8x16xf32>
    %266 = arith.select %264, %265, %262 : vector<8x16xi1>, vector<8x16xf32>
    %cst_113 = arith.constant 3.000000e-01 : f32
    %267 = vector.broadcast %cst_113 : f32 to vector<8x16xf32>
    %268 = arith.cmpf oge, %262, %267 : vector<8x16xf32>
    %269 = arith.extui %268 : vector<8x16xi1> to vector<8x16xi32>
    %270 = arith.sitofp %269 : vector<8x16xi32> to vector<8x16xf32>
    %c0_114 = arith.constant 0 : index
    %c0_115 = arith.constant 0 : index
    %c0_116 = arith.constant 0 : index
    %271 = vector.load %arg10[%c0_114, %c0_115, %c0_116] : memref<1x8x16xf32, #tpu.memory_space<vmem>>, vector<1x8x16xf32>
    %272 = vector.shape_cast %271 : vector<1x8x16xf32> to vector<8x16xf32>
    %273 = vector.shape_cast %270 : vector<8x16xf32> to vector<1x8x16xf32>
    tpu.vector_store %arg10[%c0_114, %c0_115, %c0_116], %273 {strides = array<i32>} : memref<1x8x16xf32, #tpu.memory_space<vmem>>, vector<1x8x16xf32>,
    %cst_117 = arith.constant dense<0.000000e+00> : vector<4x16xf32>
    %274 = tpu.matmul %45, %266, %cst_117 {dimension_numbers = #tpu.dot_dimension_numbers<[1], [0], [0], [1], [0, 0, 1, 1], [], []>} : vector<4x8xf32>, vector<8x16xf32>, vector<4x16xf32> -> vector<4x16xf32>
    %cst_118 = arith.constant dense<0.000000e+00> : vector<4x4xf32>
    %275 = tpu.matmul %274, %46, %cst_118 {dimension_numbers = #tpu.dot_dimension_numbers<[1], [0], [0], [1], [0, 0, 1, 1], [], []>} : vector<4x16xf32>, vector<16x4xf32>, vector<4x4xf32> -> vector<4x4xf32>
    %c0_119 = arith.constant 0 : index
    %c0_120 = arith.constant 0 : index
    %c0_121 = arith.constant 0 : index
    %276 = vector.load %arg8[%c0_119, %c0_120, %c0_121] : memref<1x4x4xf32, #tpu.memory_space<vmem>>, vector<1x4x4xf32>
    %277 = vector.shape_cast %275 : vector<4x4xf32> to vector<1x4x4xf32>
    %278 = arith.addf %276, %277 : vector<1x4x4xf32>
    %c0_122 = arith.constant 0 : index
    %c0_123 = arith.constant 0 : index
    %c0_124 = arith.constant 0 : index
    %279 = vector.load %arg8[%c0_122, %c0_123, %c0_124] : memref<1x4x4xf32, #tpu.memory_space<vmem>>, vector<1x4x4xf32>
    tpu.vector_store %arg8[%c0_122, %c0_123, %c0_124], %278 {strides = array<i32>} : memref<1x4x4xf32, #tpu.memory_space<vmem>>, vector<1x4x4xf32>,
    %cst_125 = arith.constant 7.35758876 : f32
    %280 = vector.broadcast %cst_125 : f32 to vector<8x16xf32>
    %281 = arith.mulf %262, %280 : vector<8x16xf32>
    %cst_126 = arith.constant 1.900000e+01 : f32
    %282 = vector.broadcast %cst_126 : f32 to vector<8x16xf32>
    %283 = arith.minimumf %281, %282 : vector<8x16xf32>
    %284 = arith.fptosi %283 : vector<8x16xf32> to vector<8x16xi32>
    %c0_i32_127 = arith.constant 0 : i32
    %285 = vector.broadcast %c0_i32_127 : i32 to vector<8x16xi32>
    %286 = arith.cmpi eq, %284, %285 : vector<8x16xi32>
    %cst_128 = arith.constant 0.000000e+00 : f32
    %287 = vector.broadcast %cst_128 : f32 to vector<8x16xf32>
    %288 = arith.select %286, %262, %287 : vector<8x16xi1>, vector<8x16xf32>
    %cst_129 = arith.constant dense<0.000000e+00> : vector<16xf32>
    %289 = vector.multi_reduction <add>, %288, %cst_129 [0] : vector<8x16xf32> to vector<16xf32>
    %290 = vector.shape_cast %289 : vector<16xf32> to vector<1x16xf32>
    %c1_i32_130 = arith.constant 1 : i32
    %291 = vector.broadcast %c1_i32_130 : i32 to vector<8x16xi32>
    %292 = arith.cmpi eq, %284, %291 : vector<8x16xi32>
    %cst_131 = arith.constant 0.000000e+00 : f32
    %293 = vector.broadcast %cst_131 : f32 to vector<8x16xf32>
    %294 = arith.select %292, %262, %293 : vector<8x16xi1>, vector<8x16xf32>
    %cst_132 = arith.constant dense<0.000000e+00> : vector<16xf32>
    %295 = vector.multi_reduction <add>, %294, %cst_132 [0] : vector<8x16xf32> to vector<16xf32>
    %296 = vector.shape_cast %295 : vector<16xf32> to vector<1x16xf32>
    %c2_i32_133 = arith.constant 2 : i32
    %297 = vector.broadcast %c2_i32_133 : i32 to vector<8x16xi32>
    %298 = arith.cmpi eq, %284, %297 : vector<8x16xi32>
    %cst_134 = arith.constant 0.000000e+00 : f32
    %299 = vector.broadcast %cst_134 : f32 to vector<8x16xf32>
    %300 = arith.select %298, %262, %299 : vector<8x16xi1>, vector<8x16xf32>
    %cst_135 = arith.constant dense<0.000000e+00> : vector<16xf32>
    %301 = vector.multi_reduction <add>, %300, %cst_135 [0] : vector<8x16xf32> to vector<16xf32>
    %302 = vector.shape_cast %301 : vector<16xf32> to vector<1x16xf32>
    %c3_i32_136 = arith.constant 3 : i32
    %303 = vector.broadcast %c3_i32_136 : i32 to vector<8x16xi32>
    %304 = arith.cmpi eq, %284, %303 : vector<8x16xi32>
    %cst_137 = arith.constant 0.000000e+00 : f32
    %305 = vector.broadcast %cst_137 : f32 to vector<8x16xf32>
    %306 = arith.select %304, %262, %305 : vector<8x16xi1>, vector<8x16xf32>
    %cst_138 = arith.constant dense<0.000000e+00> : vector<16xf32>
    %307 = vector.multi_reduction <add>, %306, %cst_138 [0] : vector<8x16xf32> to vector<16xf32>
    %308 = vector.shape_cast %307 : vector<16xf32> to vector<1x16xf32>
    %c4_i32_139 = arith.constant 4 : i32
    %309 = vector.broadcast %c4_i32_139 : i32 to vector<8x16xi32>
    %310 = arith.cmpi eq, %284, %309 : vector<8x16xi32>
    %cst_140 = arith.constant 0.000000e+00 : f32
    %311 = vector.broadcast %cst_140 : f32 to vector<8x16xf32>
    %312 = arith.select %310, %262, %311 : vector<8x16xi1>, vector<8x16xf32>
    %cst_141 = arith.constant dense<0.000000e+00> : vector<16xf32>
    %313 = vector.multi_reduction <add>, %312, %cst_141 [0] : vector<8x16xf32> to vector<16xf32>
    %314 = vector.shape_cast %313 : vector<16xf32> to vector<1x16xf32>
    %c5_i32_142 = arith.constant 5 : i32
    %315 = vector.broadcast %c5_i32_142 : i32 to vector<8x16xi32>
    %316 = arith.cmpi eq, %284, %315 : vector<8x16xi32>
    %cst_143 = arith.constant 0.000000e+00 : f32
    %317 = vector.broadcast %cst_143 : f32 to vector<8x16xf32>
    %318 = arith.select %316, %262, %317 : vector<8x16xi1>, vector<8x16xf32>
    %cst_144 = arith.constant dense<0.000000e+00> : vector<16xf32>
    %319 = vector.multi_reduction <add>, %318, %cst_144 [0] : vector<8x16xf32> to vector<16xf32>
    %320 = vector.shape_cast %319 : vector<16xf32> to vector<1x16xf32>
    %c6_i32_145 = arith.constant 6 : i32
    %321 = vector.broadcast %c6_i32_145 : i32 to vector<8x16xi32>
    %322 = arith.cmpi eq, %284, %321 : vector<8x16xi32>
    %cst_146 = arith.constant 0.000000e+00 : f32
    %323 = vector.broadcast %cst_146 : f32 to vector<8x16xf32>
    %324 = arith.select %322, %262, %323 : vector<8x16xi1>, vector<8x16xf32>
    %cst_147 = arith.constant dense<0.000000e+00> : vector<16xf32>
    %325 = vector.multi_reduction <add>, %324, %cst_147 [0] : vector<8x16xf32> to vector<16xf32>
    %326 = vector.shape_cast %325 : vector<16xf32> to vector<1x16xf32>
    %c7_i32_148 = arith.constant 7 : i32
    %327 = vector.broadcast %c7_i32_148 : i32 to vector<8x16xi32>
    %328 = arith.cmpi eq, %284, %327 : vector<8x16xi32>
    %cst_149 = arith.constant 0.000000e+00 : f32
    %329 = vector.broadcast %cst_149 : f32 to vector<8x16xf32>
    %330 = arith.select %328, %262, %329 : vector<8x16xi1>, vector<8x16xf32>
    %cst_150 = arith.constant dense<0.000000e+00> : vector<16xf32>
    %331 = vector.multi_reduction <add>, %330, %cst_150 [0] : vector<8x16xf32> to vector<16xf32>
    %332 = vector.shape_cast %331 : vector<16xf32> to vector<1x16xf32>
    %c8_i32_151 = arith.constant 8 : i32
    %333 = vector.broadcast %c8_i32_151 : i32 to vector<8x16xi32>
    %334 = arith.cmpi eq, %284, %333 : vector<8x16xi32>
    %cst_152 = arith.constant 0.000000e+00 : f32
    %335 = vector.broadcast %cst_152 : f32 to vector<8x16xf32>
    %336 = arith.select %334, %262, %335 : vector<8x16xi1>, vector<8x16xf32>
    %cst_153 = arith.constant dense<0.000000e+00> : vector<16xf32>
    %337 = vector.multi_reduction <add>, %336, %cst_153 [0] : vector<8x16xf32> to vector<16xf32>
    %338 = vector.shape_cast %337 : vector<16xf32> to vector<1x16xf32>
    %c9_i32_154 = arith.constant 9 : i32
    %339 = vector.broadcast %c9_i32_154 : i32 to vector<8x16xi32>
    %340 = arith.cmpi eq, %284, %339 : vector<8x16xi32>
    %cst_155 = arith.constant 0.000000e+00 : f32
    %341 = vector.broadcast %cst_155 : f32 to vector<8x16xf32>
    %342 = arith.select %340, %262, %341 : vector<8x16xi1>, vector<8x16xf32>
    %cst_156 = arith.constant dense<0.000000e+00> : vector<16xf32>
    %343 = vector.multi_reduction <add>, %342, %cst_156 [0] : vector<8x16xf32> to vector<16xf32>
    %344 = vector.shape_cast %343 : vector<16xf32> to vector<1x16xf32>
    %c10_i32_157 = arith.constant 10 : i32
    %345 = vector.broadcast %c10_i32_157 : i32 to vector<8x16xi32>
    %346 = arith.cmpi eq, %284, %345 : vector<8x16xi32>
    %cst_158 = arith.constant 0.000000e+00 : f32
    %347 = vector.broadcast %cst_158 : f32 to vector<8x16xf32>
    %348 = arith.select %346, %262, %347 : vector<8x16xi1>, vector<8x16xf32>
    %cst_159 = arith.constant dense<0.000000e+00> : vector<16xf32>
    %349 = vector.multi_reduction <add>, %348, %cst_159 [0] : vector<8x16xf32> to vector<16xf32>
    %350 = vector.shape_cast %349 : vector<16xf32> to vector<1x16xf32>
    %c11_i32_160 = arith.constant 11 : i32
    %351 = vector.broadcast %c11_i32_160 : i32 to vector<8x16xi32>
    %352 = arith.cmpi eq, %284, %351 : vector<8x16xi32>
    %cst_161 = arith.constant 0.000000e+00 : f32
    %353 = vector.broadcast %cst_161 : f32 to vector<8x16xf32>
    %354 = arith.select %352, %262, %353 : vector<8x16xi1>, vector<8x16xf32>
    %cst_162 = arith.constant dense<0.000000e+00> : vector<16xf32>
    %355 = vector.multi_reduction <add>, %354, %cst_162 [0] : vector<8x16xf32> to vector<16xf32>
    %356 = vector.shape_cast %355 : vector<16xf32> to vector<1x16xf32>
    %c12_i32_163 = arith.constant 12 : i32
    %357 = vector.broadcast %c12_i32_163 : i32 to vector<8x16xi32>
    %358 = arith.cmpi eq, %284, %357 : vector<8x16xi32>
    %cst_164 = arith.constant 0.000000e+00 : f32
    %359 = vector.broadcast %cst_164 : f32 to vector<8x16xf32>
    %360 = arith.select %358, %262, %359 : vector<8x16xi1>, vector<8x16xf32>
    %cst_165 = arith.constant dense<0.000000e+00> : vector<16xf32>
    %361 = vector.multi_reduction <add>, %360, %cst_165 [0] : vector<8x16xf32> to vector<16xf32>
    %362 = vector.shape_cast %361 : vector<16xf32> to vector<1x16xf32>
    %c13_i32_166 = arith.constant 13 : i32
    %363 = vector.broadcast %c13_i32_166 : i32 to vector<8x16xi32>
    %364 = arith.cmpi eq, %284, %363 : vector<8x16xi32>
    %cst_167 = arith.constant 0.000000e+00 : f32
    %365 = vector.broadcast %cst_167 : f32 to vector<8x16xf32>
    %366 = arith.select %364, %262, %365 : vector<8x16xi1>, vector<8x16xf32>
    %cst_168 = arith.constant dense<0.000000e+00> : vector<16xf32>
    %367 = vector.multi_reduction <add>, %366, %cst_168 [0] : vector<8x16xf32> to vector<16xf32>
    %368 = vector.shape_cast %367 : vector<16xf32> to vector<1x16xf32>
    %c14_i32_169 = arith.constant 14 : i32
    %369 = vector.broadcast %c14_i32_169 : i32 to vector<8x16xi32>
    %370 = arith.cmpi eq, %284, %369 : vector<8x16xi32>
    %cst_170 = arith.constant 0.000000e+00 : f32
    %371 = vector.broadcast %cst_170 : f32 to vector<8x16xf32>
    %372 = arith.select %370, %262, %371 : vector<8x16xi1>, vector<8x16xf32>
    %cst_171 = arith.constant dense<0.000000e+00> : vector<16xf32>
    %373 = vector.multi_reduction <add>, %372, %cst_171 [0] : vector<8x16xf32> to vector<16xf32>
    %374 = vector.shape_cast %373 : vector<16xf32> to vector<1x16xf32>
    %c15_i32_172 = arith.constant 15 : i32
    %375 = vector.broadcast %c15_i32_172 : i32 to vector<8x16xi32>
    %376 = arith.cmpi eq, %284, %375 : vector<8x16xi32>
    %cst_173 = arith.constant 0.000000e+00 : f32
    %377 = vector.broadcast %cst_173 : f32 to vector<8x16xf32>
    %378 = arith.select %376, %262, %377 : vector<8x16xi1>, vector<8x16xf32>
    %cst_174 = arith.constant dense<0.000000e+00> : vector<16xf32>
    %379 = vector.multi_reduction <add>, %378, %cst_174 [0] : vector<8x16xf32> to vector<16xf32>
    %380 = vector.shape_cast %379 : vector<16xf32> to vector<1x16xf32>
    %c16_i32_175 = arith.constant 16 : i32
    %381 = vector.broadcast %c16_i32_175 : i32 to vector<8x16xi32>
    %382 = arith.cmpi eq, %284, %381 : vector<8x16xi32>
    %cst_176 = arith.constant 0.000000e+00 : f32
    %383 = vector.broadcast %cst_176 : f32 to vector<8x16xf32>
    %384 = arith.select %382, %262, %383 : vector<8x16xi1>, vector<8x16xf32>
    %cst_177 = arith.constant dense<0.000000e+00> : vector<16xf32>
    %385 = vector.multi_reduction <add>, %384, %cst_177 [0] : vector<8x16xf32> to vector<16xf32>
    %386 = vector.shape_cast %385 : vector<16xf32> to vector<1x16xf32>
    %c17_i32_178 = arith.constant 17 : i32
    %387 = vector.broadcast %c17_i32_178 : i32 to vector<8x16xi32>
    %388 = arith.cmpi eq, %284, %387 : vector<8x16xi32>
    %cst_179 = arith.constant 0.000000e+00 : f32
    %389 = vector.broadcast %cst_179 : f32 to vector<8x16xf32>
    %390 = arith.select %388, %262, %389 : vector<8x16xi1>, vector<8x16xf32>
    %cst_180 = arith.constant dense<0.000000e+00> : vector<16xf32>
    %391 = vector.multi_reduction <add>, %390, %cst_180 [0] : vector<8x16xf32> to vector<16xf32>
    %392 = vector.shape_cast %391 : vector<16xf32> to vector<1x16xf32>
    %c18_i32_181 = arith.constant 18 : i32
    %393 = vector.broadcast %c18_i32_181 : i32 to vector<8x16xi32>
    %394 = arith.cmpi eq, %284, %393 : vector<8x16xi32>
    %cst_182 = arith.constant 0.000000e+00 : f32
    %395 = vector.broadcast %cst_182 : f32 to vector<8x16xf32>
    %396 = arith.select %394, %262, %395 : vector<8x16xi1>, vector<8x16xf32>
    %cst_183 = arith.constant dense<0.000000e+00> : vector<16xf32>
    %397 = vector.multi_reduction <add>, %396, %cst_183 [0] : vector<8x16xf32> to vector<16xf32>
    %398 = vector.shape_cast %397 : vector<16xf32> to vector<1x16xf32>
    %c19_i32_184 = arith.constant 19 : i32
    %399 = vector.broadcast %c19_i32_184 : i32 to vector<8x16xi32>
    %400 = arith.cmpi eq, %284, %399 : vector<8x16xi32>
    %cst_185 = arith.constant 0.000000e+00 : f32
    %401 = vector.broadcast %cst_185 : f32 to vector<8x16xf32>
    %402 = arith.select %400, %262, %401 : vector<8x16xi1>, vector<8x16xf32>
    %cst_186 = arith.constant dense<0.000000e+00> : vector<16xf32>
    %403 = vector.multi_reduction <add>, %402, %cst_186 [0] : vector<8x16xf32> to vector<16xf32>
    %404 = vector.shape_cast %403 : vector<16xf32> to vector<1x16xf32>
    %405 = tpu.concatenate %290, %296, %302, %308, %314, %320, %326, %332, %338, %344, %350, %356, %362, %368, %374, %380 in 0 : vector<1x16xf32>, vector<1x16xf32>, vector<1x16xf32>, vector<1x16xf32>, vector<1x16xf32>, vector<1x16xf32>, vector<1x16xf32>, vector<1x16xf32>, vector<1x16xf32>, vector<1x16xf32>, vector<1x16xf32>, vector<1x16xf32>, vector<1x16xf32>, vector<1x16xf32>, vector<1x16xf32>, vector<1x16xf32> -> vector<16x16xf32>
    %406 = tpu.concatenate %386, %392, %398, %404 in 0 : vector<1x16xf32>, vector<1x16xf32>, vector<1x16xf32>, vector<1x16xf32> -> vector<4x16xf32>
    %407 = tpu.concatenate %405, %406 in 0 : vector<16x16xf32>, vector<4x16xf32> -> vector<20x16xf32>
    %cst_187 = arith.constant dense<0.000000e+00> : vector<20xf32>
    %408 = vector.multi_reduction <add>, %407, %cst_187 [1] : vector<20x16xf32> to vector<20xf32>
    %c0_188 = arith.constant 0 : index
    %c0_189 = arith.constant 0 : index
    %c0_190 = arith.constant 0 : index
    %409 = vector.load %arg9[%c0_188, %c0_189, %c0_190] : memref<1x1x20xf32, #tpu.memory_space<vmem>>, vector<1x1x20xf32>
    %410 = vector.shape_cast %408 : vector<20xf32> to vector<1x1x20xf32>
    %411 = arith.addf %409, %410 : vector<1x1x20xf32>
    %c0_191 = arith.constant 0 : index
    %c0_192 = arith.constant 0 : index
    %c0_193 = arith.constant 0 : index
    %412 = vector.load %arg9[%c0_191, %c0_192, %c0_193] : memref<1x1x20xf32, #tpu.memory_space<vmem>>, vector<1x1x20xf32>
    tpu.vector_store %arg9[%c0_191, %c0_192, %c0_193], %411 {strides = array<i32>} : memref<1x1x20xf32, #tpu.memory_space<vmem>>, vector<1x1x20xf32>,
    return
  }
  func.func @transform_0(%arg0: i32, %arg1: i32) -> (i32, i32, i32, i32) {
    %c0_i32 = arith.constant 0 : i32
    %c0_i32_0 = arith.constant 0 : i32
    %c0_i32_1 = arith.constant 0 : i32
    return %arg0, %c0_i32, %arg1, %c0_i32_0 : i32, i32, i32, i32
  }
  func.func @transform_1(%arg0: i32, %arg1: i32) -> (i32, i32, i32) {
    %c0_i32 = arith.constant 0 : i32
    %c0_i32_0 = arith.constant 0 : i32
    %c0_i32_1 = arith.constant 0 : i32
    return %arg1, %c0_i32, %c0_i32_0 : i32, i32, i32
  }
  func.func @transform_2(%arg0: i32, %arg1: i32) -> (i32, i32) {
    %c0_i32 = arith.constant 0 : i32
    %c0_i32_0 = arith.constant 0 : i32
    %c0_i32_1 = arith.constant 0 : i32
    return %c0_i32, %c0_i32_0 : i32, i32
  }
  func.func @transform_3(%arg0: i32, %arg1: i32) -> (i32, i32, i32) {
    %c0_i32 = arith.constant 0 : i32
    %c0_i32_0 = arith.constant 0 : i32
    %c0_i32_1 = arith.constant 0 : i32
    return %arg0, %c0_i32, %c0_i32_0 : i32, i32, i32
  }
  func.func @transform_4(%arg0: i32, %arg1: i32) -> (i32, i32, i32) {
    %c0_i32 = arith.constant 0 : i32
    %c0_i32_0 = arith.constant 0 : i32
    %c0_i32_1 = arith.constant 0 : i32
    return %arg0, %c0_i32, %c0_i32_0 : i32, i32, i32
  }
  func.func @transform_5(%arg0: i32, %arg1: i32) -> (i32, i32, i32) {
    %c0_i32 = arith.constant 0 : i32
    %c0_i32_0 = arith.constant 0 : i32
    return %arg0, %arg1, %c0_i32 : i32, i32, i32
  }
  func.func @transform_6(%arg0: i32, %arg1: i32) -> (i32, i32, i32) {
    %c0_i32 = arith.constant 0 : i32
    %c0_i32_0 = arith.constant 0 : i32
    %c0_i32_1 = arith.constant 0 : i32
    return %arg0, %c0_i32, %c0_i32_0 : i32, i32, i32
  }
  func.func @transform_7(%arg0: i32, %arg1: i32) -> (i32, i32, i32) {
    %c0_i32 = arith.constant 0 : i32
    %c0_i32_0 = arith.constant 0 : i32
    %c0_i32_1 = arith.constant 0 : i32
    return %arg0, %c0_i32, %c0_i32_0 : i32, i32, i32
  }
  func.func @transform_8(%arg0: i32, %arg1: i32) -> (i32, i32, i32) {
    %c0_i32 = arith.constant 0 : i32
    %c0_i32_0 = arith.constant 0 : i32
    return %arg0, %arg1, %c0_i32 : i32, i32, i32
  }
}

</mosaic_0001>

<bundles_post_ra>
// kernel: tpu_custom_call.1
= control target key start
LH: loop header
LB: loop body
LE: loop exit
PB: predicated region body
PF: predicated region fallthrough
CT: control target
= control target key end

     0   :  { %s3494_s0 = inlined_call_operand.hbm [shape: f32[2,3,16,16], index: 0, kind: input, shape index: {}]   ;;  %s3495_s1 = inlined_call_operand.vmem [shape: f32[2,4,8], index: 1, kind: input, shape index: {}]   ;;  %s3496_s2 = inlined_call_operand.vmem [shape: f32[16,4], index: 2, kind: input, shape index: {}]   ;;  %s3497_s3 = inlined_call_operand.hbm [shape: f32[2,4,4], index: 3, kind: output, shape index: {0}]   ;;  %s3498_s4 = inlined_call_operand.hbm [shape: f32[2,1,20], index: 4, kind: output, shape index: {1}]   ;;  %s3499_s5 = inlined_call_operand.hbm [shape: f32[2,16,16], index: 5, kind: output, shape index: {2}]   ;;  %s3500_s6 = inlined_call_operand.hbm [shape: f32[2,4,4], index: 6, kind: output, shape index: {3}]   ;;  %s3501_s7 = inlined_call_operand.hbm [shape: f32[2,1,20], index: 7, kind: output, shape index: {4}]   ;;  %s3502_s8 = inlined_call_operand.hbm [shape: f32[2,16,16], index: 8, kind: output, shape index: {5}]  }
   0x1   :  { %3516 = sst [smem:[#allocation31_spill]] %s3494_s0 }
   0x2   :  { %3517 = sst [smem:[#allocation32_spill]] %s3495_s1 }
   0x3   :  { %3518 = sst [smem:[#allocation33_spill]] %s3496_s2 }
   0x4   :  { %3519 = sst [smem:[#allocation34_spill]] %s3500_s6 }
   0x5   :  { %3520 = sst [smem:[#allocation35_spill]] %s3501_s7 }
   0x6   :  { %14 = vsyncpa [#allocation3], 0 }
   0x7   :  { %16 = vsyncpa [#allocation3 + $0x1], 0 }
   0x8   :  { %17 = vsyncpa [#allocation4], 0 }
   0x9   :  { %19 = vsyncpa [#allocation4 + $0x1], 0 }
   0xa   :  { %20 = vsyncpa [#allocation7], 0 }
   0xb   :  { %22 = vsyncpa [#allocation7 + $0x1], 0 }
   0xc   :  { %23 = vsyncpa [#allocation10], 0 }
   0xd   :  { %25 = vsyncpa [#allocation10 + $0x1], 0 }
   0xe   :  { %26 = vsyncpa [#allocation13], 0 }
   0xf   :  { %28 = vsyncpa [#allocation13 + $0x1], 0  ;;  %s2686_s27 = smov 0   ;;  %s2688_s28 = smov 0  }
  0x10   :  { %s2690_s29 = smov 0   ;;  %s2692_s30 = smov 0  }
  0x11   :  { %s2694_s9 = smov 0   ;;  %s2696_s10 = smov 0  }
  0x12   :  { %s2698_s11 = smov 0   ;;  %s2700_s12 = smov 0  }
  0x13   :  { %s2702_s13 = smov 0   ;;  %s2704_s14 = smov 0  }
  0x14   :  { %s2706_s15 = smov 0  }
  0x15 LB: > { %3521 = sst [smem:[#allocation20_spill]] %s2583_s27  ;;  %s2742_s16 = sadd.s32 4294967295, %s2623_s15   ;;  %s2623_s15 = sphi %s2706_s15, %s34_s15   ;;  %s2619_s14 = sphi %s2704_s14, %s3560_s14   ;;  %s2615_s13 = sphi %s2702_s13, %s3566_s13   ;;  %s2611_s12 = sphi %s2700_s12, %s3558_s12   ;;  %s2607_s11 = sphi %s2698_s11, %s3557_s11   ;;  %s2603_s10 = sphi %s2696_s10, %s3565_s10   ;;  %s2599_s9 = sphi %s2694_s9, %s3564_s9   ;;  %s2595_s30 = sphi %s2692_s30, %s3563_s30   ;;  %s2591_s29 = sphi %s2690_s29, %s3555_s29   ;;  %s2587_s28 = sphi %s2688_s28, %s3562_s28   ;;  %s2583_s27 = sphi %s2686_s27, %s3561_s27  }
  0x16   : > { %3522 = sst [smem:[#allocation21_spill]] %s2591_s29  ;;  %s43_s18 = sadd.s32 1, %s2615_s13 }
  0x17   : > { %3523 = sst [smem:[#allocation22_spill]] %s2595_s30  ;;  %s46_s19 = sadd.s32 1, %s2619_s14 }
  0x18   : > { %3524 = sst [smem:[#allocation23_spill]] %s2615_s13  ;;  %p44_p0 = scmp.ge.s32.totalorder %s43_s18, 2 }
  0x19   : > { %3525 = sst [smem:[#allocation24_spill]] %s2619_s14  ;;  %s55_s20 = sadd.s32 1, %s2603_s10 }
  0x1a   : > { %p62_p1 = scmp.ne.s32.totalorder %s2603_s10, %s2599_s9  ;;  %p63_p2 = scmp.eq.s32.totalorder %s2623_s15, 0 }
  0x1b   : > { %s3568_s18 = smov (%p44_p0, %s43_s18), 0  ;;  %s3570_s19 = smov (!%p44_p0, %s46_s19), %s2619_s14 }
  0x1c   : > { %3526 = sst [smem:[#allocation25_spill]] %s3568_s18  ;;  %s51_s21 = ssub.s32 %s2615_s13, %s3568_s18 }
  0x1d   : > { %p2759_p3 = por %p63_p2, %p62_p1  ;;  %p48_p4 = scmp.ge.s32.totalorder %s3570_s19, 2 }
  0x1e   : > { %p68_p5 = scmp.ne.s32.totalorder %s2599_s9, %s2595_s30  ;;  %p69_p6 = scmp.eq.s32.totalorder %s2742_s16, 0 }
  0x1f   : > { %s128_s23 = sadd.s32 1, %s2591_s29  ;;  %s3572_s19 = smov (%p48_p4, %s3570_s19), 0 }
  0x20   : > { %3528 = sst [smem:[#allocation26_spill]] %s3572_s19  ;;  %p2772_p7 = por %p69_p6, %p68_p5 }
  0x21   : > { %p138_p8 = scmp.ne.s32.totalorder %s2591_s29, %s2587_s28  ;;  %s50_s25 = ssub.s32 %s2619_s14, %s3572_s19 }
  0x22   : > { %p139_p9 = scmp.eq.s32.totalorder %s2742_s16, 3  ;;  %s52_s26 = sor.u32 %s51_s21, %s50_s25 }
  0x23   : > { %p126_p10 = scmp.eq.s32.totalorder %s50_s25, 0  ;;  %p53_p11 = scmp.eq.s32.totalorder %s52_s26, 0 }
  0x24   : > { %p2781_p12 = por %p139_p9, %p138_p8  ;;  %p144_p13 = scmp.ne.s32.totalorder %s2587_s28, %s2583_s27 }
  0x25   : > { %s2786_s18 = scalar_select %p126_p10, %s2591_s29, %s128_s23  }
  0x26   : > { %s3530_s17 = scalar_select %p2781_p12, 1, 0 }
  0x27   : > { %3531 = sst [smem:[#allocation27_spill]] %s2786_s18  ;;  %s3533_s6 = sadd.s32 4294967294, %s2623_s15  }
  0x28   : > { %s2789_s7 = scalar_select %p53_p11, %s2603_s10, %s55_s20  }
  0x29   : > { %p145_p0 = scmp.eq.s32.totalorder %s3533_s6, 3  ;;  %p2798_p2 = por %p139_p9, %p62_p1 }
  0x2a   : > { %3532 = sst [smem:[#allocation28_spill]] %s2789_s7  ;;  %p2192_p8 = scmp.lt.s32.totalorder %s2623_s15, 4 }
  0x2b   : > { %s3534_s19 = scalar_select %p2798_p2, 1, 0 }
  0x2c   : > { %p2802_p4 = por %p145_p0, %p144_p13  ;;  %p2809_p6 = por %p145_p0, %p68_p5 }
  0x2d   : > { %s302_s20 = sand.u32 1, %s2603_s10   ;;  %s2149_s26 = smul.u32 6, %s2619_s14 }
  0x2e   : > { %s3535_s21 = scalar_select %p2802_p4, 1, 0 }
  0x2f   : > { %s3537_s25 = scalar_select %p2809_p6, 1, 0 }
  0x30   : > { %3536 = sst [smem:[#allocation29_spill]] %s3535_s21  ;;  %s2148_s23 = smul.u32 24, %s302_s20 }
  0x31   : > { %3538 = sst [smem:[#allocation30_spill]] %s3537_s25  ;;  %p2818_p10 = pnand %p2192_p8, %p2759_p3 }
  0x32   : > { %s311_s7 = sadd.s32 %s2615_s13, %s2149_s26  ;;  %s306_s18 = scalar_lea.vmem [#allocation2], %s2148_s23 }
  0x33   : > { %s314_s29 = sshll.u32 %s306_s18, 4  ;;  %s2076_s21 = sshll.u32 %s311_s7, 7  ;;  %s2823_s29 = int_to_ptr.vmem [resolvable:$true] %s314_s29 }
  0x34   : > { %s3540_s0 = sld [smem:[#allocation31_spill]]  ;;  %s2830_s22 = scalar_lea.sflag [#allocation3], %s302_s20 }
  0x35   : > { %p2317_p3 = pneg %p2818_p10 }
  0x3a   : > { %s2828_s25 = scalar_lea.hbm %s3540_s0, %s2076_s21  ;;  %s2320_s27 = scalar_lea.hbm %s3540_s0, 1536 }
  0x3b   : > { %s2315_s14 = scalar_lea.hbm %s2828_s25, 384  ;;  %p2321_p11 = scmp.lt.u32.totalorder %s2828_s25, %s3540_s0 }
  0x3c   : > { %p2316_p1 = scmp.ne.s32.totalorder %s2828_s25, %s2315_s14  ;;  %p2322_p13 = scmp.lt.u32.totalorder %s2320_s27, %s2315_s14 }
  0x3d   : > { %p2324_p8 = scmp.lt.u32.totalorder %s2315_s14, %s2828_s25 }
  0x3e   : > { %p2318_p5 = pnand %p2317_p3, %p2316_p1  ;;  %p2323_p0 = por %p2322_p13, %p2321_p11 }
  0x40   : > { %p2319_p9 = pneg %p2318_p5  ;;  %p2325_p6 = por %p2324_p8, %p2323_p0 }
  0x42   : > { %p2326_p4 = pnand %p2325_p6, %p2319_p9 }
  0x44   : > { %2329 = shalt.err (!%p2326_p4)
}
  0x45   : > { %s2330_s20 = scalar_lea.vmem %s2823_s29, 384  ;;  %s2625_s23 = smov [#allocation2]  }
  0x46   : > { %p2331_p1 = scmp.ne.s32.totalorder %s2823_s29, %s2330_s20  ;;  %s2335_s26 = sshll.u32 %s2625_s23, 4  ;;  %s2336_s26 = int_to_ptr.vmem [resolvable:$false] %s2335_s26 }
  0x47   : > { %s2337_s7 = scalar_lea.vmem %s2336_s26, 768  ;;  %p2338_p2 = scmp.lt.s32.totalorder %s2823_s29, %s2336_s26 }
  0x48   : > { %p2333_p5 = pnand %p2331_p1, %p2317_p3  ;;  %p2339_p11 = scmp.lt.s32.totalorder %s2337_s7, %s2330_s20 }
  0x4a   : > { %p2334_p12 = pneg %p2333_p5  ;;  %p2340_p13 = por %p2339_p11, %p2338_p2 }
  0x4c   : > { %p2341_p0 = pnand %p2340_p13, %p2334_p12 }
  0x4e   : > { %2344 = shalt.err (!%p2341_p0)
}
  0x4f   : > { %s2626_s14 = smov 256   ;;  %s2627_s18 = smov 128  }
  0x50   : > { %s2628_s27 = smov 8   ;;  %p2077_p4 = scmp.ge.s32.totalorder %s2623_s15, 1 }
  0x51   : > { %2172 = dma.hbm_to_vmem [thread:$0]  (!%p2818_p10), %s2828_s25, 384, %s2823_s29, %s2830_s22, %s2626_s14, %s2627_s18, %s2628_s27  }
  0x52   : > { %p329_p6 = scmp.lt.s32.totalorder %s2623_s15, 5 }
  0x54   : > { %p330_p3 = pnand %p2077_p4, %p329_p6 }
  0x55   : > { %s2861_s30 = sand.u32 (!%p330_p3), 1, %s2599_s9  }
  0x56   : > { %333 = sbr.rel (%p330_p3) target bundleno = 675 (0x2a3), region = 32  ;;  %s336_s20 = scalar_lea.sflag (!%p330_p3), [#allocation3], %s2861_s30 }
  0x57   : > { %s2150_s21 = smul.u32 (!%p330_p3), 24, %s2861_s30 }
  0x59   : > { %s339_s23 = scalar_lea.vmem (!%p330_p3), [#allocation2], %s2150_s21 }
  0x5d   : > { %2558 = dma.done.wait (%p2772_p7), %s336_s20, 384  }
  0x5e   : > { %2560 = vsyncadd (%p2772_p7), %s336_s20, 4294966912  ;;  %s2870_s29 = sand.u32 1, %s2587_s28   ;;  %s2079_s25 = sshll.u32 %s2861_s30, 3 }
  0x5f   : > { %s2078_s6 = sshll.u32 %s2870_s29, 2  ;;  %p399_p12 = scmp.lt.s32.totalorder %s2607_s11, 1 }
  0x60   : > { %s3541_s1 = sld [smem:[#allocation32_spill]]  ;;  %s2881_s24 = scalar_lea.vmem [#allocation5], %s2078_s6 }
  0x61   : > { %s400_s22 = scalar_select %p399_p12, %s2607_s11, 1 }
  0x62   : > { %s2884_s27 = scalar_lea.vmem [#allocation6], %s2870_s29  ;;  %s2886_s21 = scalar_lea.vmem [#allocation8], %s2079_s25 }
  0x63   : > { %s2082_s26 = sshll.u32 %s400_s22, 2  ;;  %s2888_s20 = scalar_lea.vmem [#allocation9], %s2078_s6 }
  0x64   : > { %s2891_s0 = scalar_lea.vmem [#allocation11], %s2870_s29  ;;  %s2893_s13 = scalar_lea.vmem [#allocation12], %s2079_s25 }
  0x65   : > { %p2083_p7 = scmp.ne.s32.totalorder %s2607_s11, 0 }
  0x66   : > { %s2879_s18 = scalar_lea.vmem %s3541_s1, %s2082_s26  ;;  %vm407_vm0 = vcmask (!%p2083_p7), 27648   ;;  %vm409_vm1 = vcmask (!%p2083_p7), 155648   ;;  %v2629_v0 = vmov (!%p2083_p7), 0.0  }
  0x67   : > { %406 = sbr.rel (%p2083_p7) target bundleno = 110 (0x6e), region = 40  ;;  %408 = vst.msk [vmem:[%s2881_s24] sm:$0xf] (!%p2083_p7), %vm407_vm0, %v2629_v0  ;;  %411 = vst.msk [vmem:[%s2888_s20] sm:$0xf] (!%p2083_p7), %vm407_vm0, %v2629_v0 }
  0x68   : > { %410 = vst.msk [vmem:[%s2884_s27] sm:$0x1] (!%p2083_p7), %vm409_vm1, %v2629_v0  ;;  %412 = vst.msk [vmem:[%s2891_s0] sm:$0x1] (!%p2083_p7), %vm409_vm1, %v2629_v0 }
  0x6e PF: > { %v413_v1 = vld [vmem:[%s339_s23] sm:$0xff]  ;;  %v414_v2 = vld [vmem:[%s339_s23 + $0x8] sm:$0xff]  ;;  %v415_v3 = vld [vmem:[%s339_s23 + $0x10] sm:$0xff]  ;;  %v2630_v4 = vmov 0.0   ;;  %vm2631_vm2 = vmmov 0   ;;  %s3542_s2 = sld [smem:[#allocation33_spill]] }
  0x6f   : > { %2118 = vmatprep.subr.mxu0 %v2630_v4  ;;  %v416_v5 = vmax.f32 %v413_v1, 1e-06  ;;  %v417_v6 = vmax.f32 %v414_v2, 1e-06  ;;  %v418_v7 = vmax.f32 %v415_v3, 1e-06  ;;  %2120 = vmatprep.mubr.msk.f32.mxu0 %vm2631_vm2, %v2630_v4 }
  0x70   : > { %2127 = vmatprep.mubr.msk.f32.mxu1 %vm2631_vm2, %v2630_v4  ;;  %v2632_v0 = vmov 0.0|0.0   ;;  %vm471_vm3 = vcmask 64512   ;;  %vm469_vm8 = vcmask 130048   ;;  %vm805_vm1 = vcmask 1040384   ;;  %s2100_s26 = sshll.u32 %s2611_s12, 1  ;;  %s1827_s6 = sshll.u32 %s2893_s13, 4  ;;  %s1828_s6 = int_to_ptr.vmem [resolvable:$true] %s1827_s6 }
  0x71   : > { %2293 = vlog2.f32 %v416_v5  ;;  %2142 = vmatprep.subr.bf16.mxu1 %v2632_v0  ;;  %s3212_s7 = sadd.s32 %s2607_s11, %s2100_s26  ;;  %s1745_s22 = scalar_lea.sflag [#allocation13], %s2861_s30 }
  0x72   : > { %2295 = vlog2.f32 %v417_v6  ;;  %s2101_s14 = sshll.u32 %s3212_s7, 7  ;;  %s2345_s1 = scalar_lea.vmem %s1828_s6, 128 }
  0x73   : > { %2297 = vlog2.f32 %v418_v7  ;;  %s3220_s25 = scalar_lea.hbm %s3502_s8, %s2101_s14  ;;  %p2346_p2 = scmp.ne.s32.totalorder %s1828_s6, %s2345_s1 }
  0x74   : > { %v440_v61 = vld [vmem:[%s3542_s2] sm:$0xff]  ;;  %v441_v62 = vld [vmem:[%s3542_s2 + $0x8] sm:$0xff]  ;;  %p3543_p10 = scmp.ne.s32.totalorder %s3534_s19, 0  ;;  %s2635_s2 = smov [#allocation12]  }
  0x75   : > { %v2911_v1 = vpack.c.bf16 %v441_v62, %v440_v61  ;;  %s2349_s11 = sshll.u32 %s2635_s2, 4  ;;  %s2350_s11 = int_to_ptr.vmem [resolvable:$false] %s2349_s11 }
  0x76   : > { %p2347_p9 = pnand %p2346_p2, %p3543_p10  ;;  %s2351_s26 = scalar_lea.vmem %s2350_s11, 256 }
  0x77   : > { %2144 = vmatpush3.bf16.msra.mxu1 %v2911_v1  ;;  %p2352_p1 = scmp.lt.s32.totalorder %s1828_s6, %s2350_s11  ;;  %p2353_p5 = scmp.lt.s32.totalorder %s2351_s26, %s2345_s1 }
  0x78   : > { %2145 = vmatprep.subr.bf16.mxu1 %v2632_v0  ;;  %p2348_p8 = pneg %p2347_p9 }
  0x79   : > { %p2354_p11 = por %p2353_p5, %p2352_p1 }
  0x7b   : > { %v2294_v8 = vpop.eup %2293  ;;  %p2355_p13 = pnand %p2354_p11, %p2348_p8 }
  0x7c   : > { %v2296_v9 = vpop.eup %2295  ;;  %v420_v10 = vmul.f32 0.6931472, %v2294_v8 }
  0x7d   : > { %v2298_v11 = vpop.eup %2297  ;;  %v422_v12 = vmul.f32 0.6931472, %v2296_v9 }
  0x7e   : > { %v424_v13 = vmul.f32 0.6931472, %v2298_v11  ;;  %v425_v14 = vmul.f32 1.8779827, %v420_v10  ;;  %v432_v15 = vmul.f32 -0.5561158, %v420_v10 }
  0x7f   : > { %v426_v16 = vmul.f32 -0.06590806, %v422_v12  ;;  %v433_v17 = vmul.f32 -0.1355218, %v422_v12  ;;  %v439_v12 = vld [vmem:[%s2879_s18] sm:$0xf] }
  0x80   : > { %v428_v18 = vmul.f32 -0.6019074, %v424_v13  ;;  %v435_v19 = vmul.f32 1.573588, %v424_v13 }
  0x81   : > { %v427_v20 = vadd.f32 %v426_v16, %v425_v14  ;;  %v434_v21 = vadd.f32 %v433_v17, %v432_v15 }
  0x83   : > { %v429_v22 = vadd.f32 %v428_v18, %v427_v20  ;;  %v436_v23 = vadd.f32 %v435_v19, %v434_v21 }
  0x85   : > { %v430_v24 = vsub.f32 0.0, %v429_v22  ;;  %v437_v25 = vsub.f32 0.0, %v436_v23 }
  0x87   : > { %v431_v26 = vmax.f32 %v430_v24, 0.0  ;;  %v438_v27 = vmax.f32 %v437_v25, 0.0 }
  0x89   : > { %v442_v28 = vsub.f32 0.0, %v431_v26  ;;  %v1092_v29 = vsub.f32 0.0, %v438_v27 }
  0x8b   : > { %v443_v30 = vmul.f32 0.65, %v442_v28  ;;  %v447_v31 = vmul.f32 0.7, %v442_v28  ;;  %v452_v32 = vmul.f32 0.29, %v442_v28 }
  0x8c   : > { %v1093_v33 = vmul.f32 0.27, %v1092_v29  ;;  %v1097_v34 = vmul.f32 0.57, %v1092_v29  ;;  %v1102_v35 = vmul.f32 0.78, %v1092_v29 }
  0x8d   : > { %v444_v36 = vmul.f32 1.442695, %v443_v30  ;;  %v448_v37 = vmul.f32 1.442695, %v447_v31  ;;  %v453_v38 = vmul.f32 1.442695, %v452_v32 }
  0x8e   : > { %v1094_v39 = vmul.f32 1.442695, %v1093_v33  ;;  %v1098_v40 = vmul.f32 1.442695, %v1097_v34  ;;  %v1103_v41 = vmul.f32 1.442695, %v1102_v35 }
  0x8f   : > { %2299 = vpow2.f32 %v444_v36 }
  0x90   : > { %2301 = vpow2.f32 %v448_v37 }
  0x91   : > { %2303 = vpow2.f32 %v453_v38 }
  0x92   : > { %2305 = vpow2.f32 %v1094_v39 }
  0x93   : > { %2307 = vpow2.f32 %v1098_v40 }
  0x94   : > { %2309 = vpow2.f32 %v1103_v41 }
  0x99   : > { %v2300_v42 = vpop.eup %2299 }
  0x9a   : > { %v2302_v43 = vpop.eup %2301  ;;  %v446_v44 = vmul.f32 0.2125, %v2300_v42 }
  0x9b   : > { %v2304_v45 = vpop.eup %2303  ;;  %v450_v46 = vmul.f32 0.7154, %v2302_v43 }
  0x9c   : > { %v2306_v47 = vpop.eup %2305  ;;  %v455_v48 = vmul.f32 0.0721, %v2304_v45 }
  0x9d   : > { %v2308_v49 = vpop.eup %2307  ;;  %v451_v50 = vadd.f32 %v450_v46, %v446_v44  ;;  %v1096_v51 = vmul.f32 0.2125, %v2306_v47 }
  0x9e   : > { %v2310_v52 = vpop.eup %2309  ;;  %v1100_v53 = vmul.f32 0.7154, %v2308_v49 }
  0x9f   : > { %v456_v54 = vadd.f32 %v455_v48, %v451_v50  ;;  %v1105_v55 = vmul.f32 0.0721, %v2310_v52 }
  0xa0   : > { %v1101_v56 = vadd.f32 %v1100_v53, %v1096_v51 }
  0xa1   : > { %v457_v57 = vadd.f32 0.022453224, %v456_v54 }
  0xa2   : > { %v1106_v58 = vadd.f32 %v1105_v55, %v1101_v56 }
  0xa3   : > { %2311 = vlog2.f32 %v457_v57 }
  0xa4   : > { %v1107_v59 = vadd.f32 0.022453224, %v1106_v58 }
  0xa6   : > { %2313 = vlog2.f32 %v1107_v59 }
  0xad   : > { %v2312_v60 = vpop.eup %2311 }
  0xae   : > { %v459_v63 = vmul.f32 0.6931472, %v2312_v60 }
  0xb0   : > { %v2314_v2 = vpop.eup %2313  ;;  %v460_v3 = vsub.f32 0.0, %v459_v63 }
  0xb1   : > { %v1109_v5 = vmul.f32 0.6931472, %v2314_v2 }
  0xb2   : > { %v461_v6 = vmul.f32 0.4342945, %v460_v3 }
  0xb3   : > { %v1110_v7 = vsub.f32 0.0, %v1109_v5 }
  0xb4   : > { %v462_v8 = vmax.f32 %v461_v6, 0.0 }
  0xb5   : > { %v1111_v9 = vmul.f32 0.4342945, %v1110_v7 }
  0xb6   : > { %v2914_v10 = vmul.f32 %v462_v8, %v462_v8 }
  0xb7   : > { %v1112_v11 = vmax.f32 %v1111_v9, 0.0 }
  0xb8   : > { %vm464_vm4 = vcmp.lt.f32.partialorder %v2914_v10, 0.05  ;;  %v622_v13 = vmul.f32 7.357589, %v2914_v10 }
  0xb9   : > { %vm2085_vm5 = vmneg %vm464_vm4  ;;  %v2919_v14 = vmul.f32 %v1112_v11, %v1112_v11  ;;  %vm809_vm4 = vcmask 1042432  }
  0xba   : > { %2119 = vmatpush3.msk.msra.mxu0 %vm2085_vm5, %v2914_v10  ;;  %v623_v15 = vmin.f32 %v622_v13, 19.0  ;;  %vm811_vm5 = vcmask 1043456  }
  0xbb   : > { %2121 = vmatmul.mubr.msk.f32.vlgmr.msra.gmra.mrb[0].mxu0 %vm471_vm3, %v439_v12  ;;  %2130 = vmatprep.subr.mxu0 %v2630_v4  ;;  %vm1114_vm6 = vcmp.lt.f32.partialorder %v2919_v14, 0.05  ;;  %v1266_v16 = vmul.f32 7.357589, %v2919_v14 }
  0xbc   : > { %vm2090_vm7 = vmneg %vm1114_vm6  ;;  %2132 = vmatprep.mubr.msk.f32.mxu0 %vm2631_vm2, %v2630_v4  ;;  %v2151_v17 = vtrunc.f32 %v623_v15  ;;  %vm813_vm6 = vcmask 1044480  }
  0xbd   : > { %2131 = vmatpush3.msk.msra.mxu0 %vm2090_vm7, %v2919_v14  ;;  %v1267_v18 = vmin.f32 %v1266_v16, 19.0  ;;  %vm815_vm7 = vcmask 1045504  }
  0xbe   : > { %v2929_v19 = vcvt.f32.s32 %v2151_v17 }
  0xbf   : > { %2133 = vmatmul.mubr.msk.f32.vlgmr.msra.gmra.mrb[2].mxu0 %vm471_vm3, %v439_v12  ;;  %v2932_v20 = vtrunc.f32 %v1267_v18  ;;  %vm807_vm3 = vcmask 1041408  }
  0xc0   : > { %vm625_vm9 = vcmp.eq.s32.totalorder %v2929_v19, 0  ;;  %vm634_vm10 = vcmp.eq.s32.totalorder %v2929_v19, 1  ;;  %vm643_vm11 = vcmp.eq.s32.totalorder %v2929_v19, 2  ;;  %vm652_vm12 = vcmp.eq.s32.totalorder %v2929_v19, 3 }
  0xc1   : > { %v626_v21 = vsel %vm625_vm9, %v2914_v10, 0.0  ;;  %v635_v22 = vsel %vm634_vm10, %v2914_v10, 0.0  ;;  %v644_v23 = vsel %vm643_vm11, %v2914_v10, 0.0  ;;  %v653_v24 = vsel %vm652_vm12, %v2914_v10, 0.0 }
  0xc2   : > { %v627_v25 = vsel %vm469_vm8, %v626_v21, 0.0  ;;  %v636_v26 = vsel %vm469_vm8, %v635_v22, 0.0  ;;  %v645_v27 = vsel %vm469_vm8, %v644_v23, 0.0  ;;  %v654_v28 = vsel %vm469_vm8, %v653_v24, 0.0 }
  0xc3   : > { %v628_v29 = vrot.slane %v627_v25, 4  ;;  %v637_v30 = vrot.slane %v636_v26, 4  ;;  %v646_v31 = vrot.slane %v645_v27, 4  ;;  %v655_v32 = vrot.slane %v654_v28, 4 }
  0xc4   : > { %vm661_vm13 = vcmp.eq.s32.totalorder %v2929_v19, 4  ;;  %vm670_vm14 = vcmp.eq.s32.totalorder %v2929_v19, 5  ;;  %vm679_vm15 = vcmp.eq.s32.totalorder %v2929_v19, 6  ;;  %vm688_vm0 = vcmp.eq.s32.totalorder %v2929_v19, 7 }
  0xc5   : > { %v629_v33 = vadd.f32 %v628_v29, %v627_v25  ;;  %v638_v34 = vadd.f32 %v637_v30, %v636_v26  ;;  %v647_v35 = vadd.f32 %v646_v31, %v645_v27  ;;  %v656_v36 = vadd.f32 %v655_v32, %v654_v28 }
  0xc6   : > { %v662_v37 = vsel %vm661_vm13, %v2914_v10, 0.0  ;;  %v671_v38 = vsel %vm670_vm14, %v2914_v10, 0.0  ;;  %v680_v39 = vsel %vm679_vm15, %v2914_v10, 0.0  ;;  %v689_v40 = vsel %vm688_vm0, %v2914_v10, 0.0 }
  0xc7   : > { %v630_v41 = vrot.slane %v629_v33, 2  ;;  %v639_v42 = vrot.slane %v638_v34, 2  ;;  %v648_v43 = vrot.slane %v647_v35, 2  ;;  %v657_v44 = vrot.slane %v656_v36, 2 }
  0xc8   : > { %v663_v45 = vsel %vm469_vm8, %v662_v37, 0.0  ;;  %v672_v46 = vsel %vm469_vm8, %v671_v38, 0.0  ;;  %v681_v47 = vsel %vm469_vm8, %v680_v39, 0.0  ;;  %v690_v48 = vsel %vm469_vm8, %v689_v40, 0.0 }
  0xc9   : > { %v631_v49 = vadd.f32 %v630_v41, %v629_v33  ;;  %v640_v50 = vadd.f32 %v639_v42, %v638_v34  ;;  %v649_v51 = vadd.f32 %v648_v43, %v647_v35  ;;  %v658_v52 = vadd.f32 %v657_v44, %v656_v36 }
  0xca   : > { %v664_v53 = vrot.slane %v663_v45, 4  ;;  %v673_v54 = vrot.slane %v672_v46, 4  ;;  %v682_v55 = vrot.slane %v681_v47, 4  ;;  %v691_v56 = vrot.slane %v690_v48, 4 }
  0xcb   : > { %v632_v57 = vrot.slane %v631_v49, 1  ;;  %v641_v58 = vrot.slane %v640_v50, 1  ;;  %v650_v59 = vrot.slane %v649_v51, 1  ;;  %v659_v60 = vrot.slane %v658_v52, 1 }
  0xcc   : > { %v665_v61 = vadd.f32 %v664_v53, %v663_v45  ;;  %v674_v62 = vadd.f32 %v673_v54, %v672_v46  ;;  %v683_v63 = vadd.f32 %v682_v55, %v681_v47  ;;  %v692_v0 = vadd.f32 %v691_v56, %v690_v48 }
  0xcd   : > { %v633_v2 = vadd.f32 %v632_v57, %v631_v49  ;;  %v642_v3 = vadd.f32 %v641_v58, %v640_v50  ;;  %v651_v5 = vadd.f32 %v650_v59, %v649_v51  ;;  %v660_v6 = vadd.f32 %v659_v60, %v658_v52 }
  0xce   : > { %v666_v7 = vrot.slane %v665_v61, 2  ;;  %v675_v8 = vrot.slane %v674_v62, 2  ;;  %v684_v9 = vrot.slane %v683_v63, 2  ;;  %v693_v11 = vrot.slane %v692_v0, 2 }
  0xcf   : > { %vm817_vm9 = vcmask 1046528   ;;  %v806_v12 = vsel %vm805_vm1, %v633_v2, %v642_v3  ;;  %vm697_vm10 = vcmp.eq.s32.totalorder %v2929_v19, 8  ;;  %vm706_vm11 = vcmp.eq.s32.totalorder %v2929_v19, 9 }
  0xd0   : > { %vm715_vm12 = vcmp.eq.s32.totalorder %v2929_v19, 10  ;;  %v667_v13 = vadd.f32 %v666_v7, %v665_v61  ;;  %v676_v15 = vadd.f32 %v675_v8, %v674_v62  ;;  %v685_v16 = vadd.f32 %v684_v9, %v683_v63 }
  0xd1   : > { %v694_v17 = vadd.f32 %v693_v11, %v692_v0  ;;  %v808_v18 = vsel %vm807_vm3, %v806_v12, %v651_v5  ;;  %v698_v21 = vsel %vm697_vm10, %v2914_v10, 0.0  ;;  %v707_v22 = vsel %vm706_vm11, %v2914_v10, 0.0 }
  0xd2   : > { %v716_v23 = vsel %vm715_vm12, %v2914_v10, 0.0  ;;  %v668_v24 = vrot.slane %v667_v13, 1  ;;  %v677_v25 = vrot.slane %v676_v15, 1  ;;  %v686_v26 = vrot.slane %v685_v16, 1 }
  0xd3   : > { %v695_v27 = vrot.slane %v694_v17, 1  ;;  %v810_v28 = vsel %vm809_vm4, %v808_v18, %v660_v6  ;;  %v699_v29 = vsel %vm469_vm8, %v698_v21, 0.0  ;;  %v708_v30 = vsel %vm469_vm8, %v707_v22, 0.0 }
  0xd4   : > { %v717_v31 = vsel %vm469_vm8, %v716_v23, 0.0  ;;  %v669_v32 = vadd.f32 %v668_v24, %v667_v13  ;;  %v678_v33 = vadd.f32 %v677_v25, %v676_v15  ;;  %v687_v34 = vadd.f32 %v686_v26, %v685_v16 }
  0xd5   : > { %v696_v35 = vadd.f32 %v695_v27, %v694_v17  ;;  %v700_v36 = vrot.slane %v699_v29, 4  ;;  %v709_v37 = vrot.slane %v708_v30, 4  ;;  %v718_v38 = vrot.slane %v717_v31, 4 }
  0xd6   : > { %vm724_vm13 = vcmp.eq.s32.totalorder %v2929_v19, 11  ;;  %v812_v39 = vsel %vm811_vm5, %v810_v28, %v669_v32  ;;  %vm733_vm14 = vcmp.eq.s32.totalorder %v2929_v19, 12  ;;  %vm742_vm15 = vcmp.eq.s32.totalorder %v2929_v19, 13 }
  0xd7   : > { %v725_v40 = vsel %vm724_vm13, %v2914_v10, 0.0  ;;  %v814_v41 = vsel %vm813_vm6, %v812_v39, %v678_v33  ;;  %v701_v42 = vadd.f32 %v700_v36, %v699_v29  ;;  %v710_v43 = vadd.f32 %v709_v37, %v708_v30 }
  0xd8   : > { %v719_v44 = vadd.f32 %v718_v38, %v717_v31  ;;  %v816_v45 = vsel %vm815_vm7, %v814_v41, %v687_v34  ;;  %v726_v46 = vsel %vm469_vm8, %v725_v40, 0.0  ;;  %v734_v47 = vsel %vm733_vm14, %v2914_v10, 0.0 }
  0xd9   : > { %v743_v48 = vsel %vm742_vm15, %v2914_v10, 0.0  ;;  %v818_v49 = vsel %vm817_vm9, %v816_v45, %v696_v35  ;;  %v702_v50 = vrot.slane %v701_v42, 2  ;;  %v711_v51 = vrot.slane %v710_v43, 2 }
  0xda   : > { %v720_v52 = vrot.slane %v719_v44, 2  ;;  %v829_v53 = vsel %vm469_vm8, %v818_v49, 0.0  ;;  %v727_v54 = vrot.slane %v726_v46, 4  ;;  %v735_v55 = vsel %vm469_vm8, %v734_v47, 0.0 }
  0xdb   : > { %v744_v56 = vsel %vm469_vm8, %v743_v48, 0.0  ;;  %830 = vadd.xlane.f32.xlu0 %v829_v53  ;;  %v703_v57 = vadd.f32 %v702_v50, %v701_v42  ;;  %v712_v58 = vadd.f32 %v711_v51, %v710_v43  ;;  %v736_v60 = vrot.slane %v735_v55, 4 }
  0xdc   : > { %v721_v59 = vadd.f32 %v720_v52, %v719_v44  ;;  %v728_v61 = vadd.f32 %v727_v54, %v726_v46  ;;  %v745_v62 = vrot.slane %v744_v56, 4  ;;  %vm751_vm0 = vcmp.eq.s32.totalorder %v2929_v19, 14 }
  0xdd   : > { %vm760_vm10 = vcmp.eq.s32.totalorder %v2929_v19, 15  ;;  %v704_v63 = vrot.slane %v703_v57, 1  ;;  %v713_v0 = vrot.slane %v712_v58, 1  ;;  %v737_v3 = vadd.f32 %v736_v60, %v735_v55 }
  0xde   : > { %v722_v2 = vrot.slane %v721_v59, 1  ;;  %v729_v5 = vrot.slane %v728_v61, 2  ;;  %v746_v6 = vadd.f32 %v745_v62, %v744_v56  ;;  %v752_v7 = vsel %vm751_vm0, %v2914_v10, 0.0 }
  0xdf   : > { %v761_v8 = vsel %vm760_vm10, %v2914_v10, 0.0  ;;  %v705_v9 = vadd.f32 %v704_v63, %v703_v57  ;;  %v714_v11 = vadd.f32 %v713_v0, %v712_v58  ;;  %v738_v13 = vrot.slane %v737_v3, 2 }
  0xe0   : > { %v723_v12 = vadd.f32 %v722_v2, %v721_v59  ;;  %v730_v15 = vadd.f32 %v729_v5, %v728_v61  ;;  %v747_v16 = vrot.slane %v746_v6, 2  ;;  %v753_v17 = vsel %vm469_vm8, %v752_v7, 0.0 }
  0xe1   : > { %v762_v18 = vsel %vm469_vm8, %v761_v8, 0.0  ;;  %v739_v21 = vadd.f32 %v738_v13, %v737_v3  ;;  %v754_v22 = vrot.slane %v753_v17, 4  ;;  %v819_v24 = vsel %vm805_vm1, %v705_v9, %v714_v11 }
  0xe2   : > { %v763_v23 = vrot.slane %v762_v18, 4  ;;  %v731_v25 = vrot.slane %v730_v15, 1  ;;  %v748_v26 = vadd.f32 %v747_v16, %v746_v6  ;;  %v820_v27 = vsel %vm807_vm3, %v819_v24, %v723_v12 }
  0xe3   : > { %vm769_vm11 = vcmp.eq.s32.totalorder %v2929_v19, 16  ;;  %v740_v28 = vrot.slane %v739_v21, 1  ;;  %v755_v29 = vadd.f32 %v754_v22, %v753_v17  ;;  %vm778_vm12 = vcmp.eq.s32.totalorder %v2929_v19, 17 }
  0xe4   : > { %v764_v30 = vadd.f32 %v763_v23, %v762_v18  ;;  %v770_v31 = vsel %vm769_vm11, %v2914_v10, 0.0  ;;  %v732_v32 = vadd.f32 %v731_v25, %v730_v15  ;;  %v749_v33 = vrot.slane %v748_v26, 1 }
  0xe5   : > { %v771_v34 = vsel %vm469_vm8, %v770_v31, 0.0  ;;  %v741_v35 = vadd.f32 %v740_v28, %v739_v21  ;;  %v756_v36 = vrot.slane %v755_v29, 2  ;;  %v779_v41 = vsel %vm778_vm12, %v2914_v10, 0.0 }
  0xe6   : > { %v765_v37 = vrot.slane %v764_v30, 2  ;;  %v772_v38 = vrot.slane %v771_v34, 4  ;;  %v750_v39 = vadd.f32 %v749_v33, %v748_v26  ;;  %v821_v40 = vsel %vm809_vm4, %v820_v27, %v732_v32 }
  0xe7   : > { %vm787_vm13 = vcmp.eq.s32.totalorder %v2929_v19, 18  ;;  %v757_v42 = vadd.f32 %v756_v36, %v755_v29  ;;  %v822_v44 = vsel %vm811_vm5, %v821_v40, %v741_v35  ;;  %v780_v46 = vsel %vm469_vm8, %v779_v41, 0.0 }
  0xe8   : > { %v766_v43 = vadd.f32 %v765_v37, %v764_v30  ;;  %v773_v45 = vadd.f32 %v772_v38, %v771_v34  ;;  %v788_v47 = vsel %vm787_vm13, %v2914_v10, 0.0  ;;  %vm796_vm14 = vcmp.eq.s32.totalorder %v2929_v19, 19 }
  0xe9   : > { %v758_v48 = vrot.slane %v757_v42, 1  ;;  %v781_v51 = vrot.slane %v780_v46, 4  ;;  %v823_v52 = vsel %vm813_vm6, %v822_v44, %v750_v39  ;;  %v789_v53 = vsel %vm469_vm8, %v788_v47, 0.0 }
  0xea   : > { %v767_v49 = vrot.slane %v766_v43, 1  ;;  %v774_v50 = vrot.slane %v773_v45, 2  ;;  %v797_v54 = vsel %vm796_vm14, %v2914_v10, 0.0  ;;  %v3007_v55 = vcvt.f32.s32 %v2932_v20 }
  0xeb   : > { %v759_v56 = vadd.f32 %v758_v48, %v757_v42  ;;  %v782_v59 = vadd.f32 %v781_v51, %v780_v46  ;;  %v790_v60 = vrot.slane %v789_v53, 4  ;;  %v798_v19 = vsel %vm469_vm8, %v797_v54, 0.0 }
  0xec   : > { %v768_v57 = vadd.f32 %v767_v49, %v766_v43  ;;  %v775_v58 = vadd.f32 %v774_v50, %v773_v45  ;;  %vm1269_vm15 = vcmp.eq.s32.totalorder %v3007_v55, 0  ;;  %vm1278_vm0 = vcmp.eq.s32.totalorder %v3007_v55, 1 }
  0xed   : > { %v824_v61 = vsel %vm815_vm7, %v823_v52, %v759_v56  ;;  %v783_v63 = vrot.slane %v782_v59, 2  ;;  %v799_v0 = vrot.slane %v798_v19, 4  ;;  %v791_v20 = vadd.f32 %v790_v60, %v789_v53 }
  0xee   : > { %v776_v62 = vrot.slane %v775_v58, 1  ;;  %v825_v2 = vsel %vm817_vm9, %v824_v61, %v768_v57  ;;  %v1270_v3 = vsel %vm1269_vm15, %v2919_v14, 0.0  ;;  %v1279_v5 = vsel %vm1278_vm0, %v2919_v14, 0.0 }
  0xef   : > { %v832_v6 = vsel %vm469_vm8, %v825_v2, 0.0  ;;  %v784_v8 = vadd.f32 %v783_v63, %v782_v59  ;;  %v800_v9 = vadd.f32 %v799_v0, %v798_v19  ;;  %vm835_vm10 = vcmask 125952  }
  0xf0   : > { %v777_v7 = vadd.f32 %v776_v62, %v775_v58  ;;  %833 = vadd.xlane.f32.xlu0 %v832_v6  ;;  %v792_v11 = vrot.slane %v791_v20, 2  ;;  %v1271_v12 = vsel %vm469_vm8, %v1270_v3, 0.0  ;;  %v1280_v13 = vsel %vm469_vm8, %v1279_v5, 0.0 }
  0xf1   : > { %vm1287_vm11 = vcmp.eq.s32.totalorder %v3007_v55, 2  ;;  %v785_v15 = vrot.slane %v784_v8, 1  ;;  %v801_v16 = vrot.slane %v800_v9, 2  ;;  %v1272_v17 = vrot.slane %v1271_v12, 4 }
  0xf2   : > { %v1281_v18 = vrot.slane %v1280_v13, 4  ;;  %v793_v21 = vadd.f32 %v792_v11, %v791_v20  ;;  %v1288_v22 = vsel %vm1287_vm11, %v2919_v14, 0.0  ;;  %vm1296_vm12 = vcmp.eq.s32.totalorder %v3007_v55, 3 }
  0xf3   : > { %vm1305_vm13 = vcmp.eq.s32.totalorder %v3007_v55, 4  ;;  %v786_v23 = vadd.f32 %v785_v15, %v784_v8  ;;  %v802_v24 = vadd.f32 %v801_v16, %v800_v9  ;;  %v1273_v25 = vadd.f32 %v1272_v17, %v1271_v12 }
  0xf4   : > { %v1282_v26 = vadd.f32 %v1281_v18, %v1280_v13  ;;  %v794_v27 = vrot.slane %v793_v21, 1  ;;  %v1289_v28 = vsel %vm469_vm8, %v1288_v22, 0.0  ;;  %v1297_v29 = vsel %vm1296_vm12, %v2919_v14, 0.0 }
  0xf5   : > { %v1306_v30 = vsel %vm1305_vm13, %v2919_v14, 0.0  ;;  %v803_v31 = vrot.slane %v802_v24, 1  ;;  %v826_v32 = vsel %vm805_vm1, %v777_v7, %v786_v23  ;;  %v1274_v33 = vrot.slane %v1273_v25, 2 }
  0xf6   : > { %v1283_v34 = vrot.slane %v1282_v26, 2  ;;  %v795_v35 = vadd.f32 %v794_v27, %v793_v21  ;;  %v1290_v36 = vrot.slane %v1289_v28, 4  ;;  %v1298_v37 = vsel %vm469_vm8, %v1297_v29, 0.0 }
  0xf7   : > { %v1307_v38 = vsel %vm469_vm8, %v1306_v30, 0.0  ;;  %v804_v39 = vadd.f32 %v803_v31, %v802_v24  ;;  %v1275_v40 = vadd.f32 %v1274_v33, %v1273_v25  ;;  %v1299_v42 = vrot.slane %v1298_v37, 4 }
  0xf8   : > { %v1284_v41 = vadd.f32 %v1283_v34, %v1282_v26  ;;  %v827_v43 = vsel %vm807_vm3, %v826_v32, %v795_v35  ;;  %v1291_v44 = vadd.f32 %v1290_v36, %v1289_v28  ;;  %v1308_v45 = vrot.slane %v1307_v38, 4 }
  0xf9   : > { %vm1314_vm14 = vcmp.eq.s32.totalorder %v3007_v55, 5  ;;  %v828_v46 = vsel %vm809_vm4, %v827_v43, %v804_v39  ;;  %v1276_v47 = vrot.slane %v1275_v40, 1  ;;  %v1300_v49 = vadd.f32 %v1299_v42, %v1298_v37 }
  0xfa   : > { %v1285_v48 = vrot.slane %v1284_v41, 1  ;;  %v836_v50 = vsel %vm835_vm10, %v828_v46, 0.0  ;;  %v1292_v51 = vrot.slane %v1291_v44, 2  ;;  %v1309_v52 = vadd.f32 %v1308_v45, %v1307_v38 }
  0xfb   : > { %v1315_v53 = vsel %vm1314_vm14, %v2919_v14, 0.0  ;;  %837 = vadd.xlane.f32.xlu0 %v836_v50  ;;  %v1277_v54 = vadd.f32 %v1276_v47, %v1275_v40  ;;  %v1301_v57 = vrot.slane %v1300_v49, 2  ;;  %vm1323_vm15 = vcmp.eq.s32.totalorder %v3007_v55, 6 }
  0xfc   : > { %v1286_v56 = vadd.f32 %v1285_v48, %v1284_v41  ;;  %v1316_v58 = vsel %vm469_vm8, %v1315_v53, 0.0  ;;  %v1293_v59 = vadd.f32 %v1292_v51, %v1291_v44  ;;  %v1310_v60 = vrot.slane %v1309_v52, 2 }
  0xfd   : > { %v1317_v19 = vrot.slane %v1316_v58, 4  ;;  %v1302_v61 = vadd.f32 %v1301_v57, %v1300_v49  ;;  %v1324_v62 = vsel %vm1323_vm15, %v2919_v14, 0.0  ;;  %vm1332_vm0 = vcmp.eq.s32.totalorder %v3007_v55, 7 }
  0xfe   : > { %v1449_v63 = vsel %vm805_vm1, %v1277_v54, %v1286_v56  ;;  %v1294_v0 = vrot.slane %v1293_v59, 1  ;;  %v1311_v2 = vadd.f32 %v1310_v60, %v1309_v52  ;;  %v1325_v3 = vsel %vm469_vm8, %v1324_v62, 0.0 }
  0xff   : > { %v1318_v20 = vadd.f32 %v1317_v19, %v1316_v58  ;;  %v1303_v5 = vrot.slane %v1302_v61, 1  ;;  %v1326_v6 = vrot.slane %v1325_v3, 4  ;;  %v1333_v7 = vsel %vm1332_vm0, %v2919_v14, 0.0 }
 0x100   : > { %vm1341_vm11 = vcmp.eq.s32.totalorder %v3007_v55, 8  ;;  %v1295_v8 = vadd.f32 %v1294_v0, %v1293_v59  ;;  %v1312_v9 = vrot.slane %v1311_v2, 1  ;;  %v1334_v12 = vsel %vm469_vm8, %v1333_v7, 0.0 }
 0x101   : > { %v1319_v11 = vrot.slane %v1318_v20, 2  ;;  %v1304_v13 = vadd.f32 %v1303_v5, %v1302_v61  ;;  %v1327_v15 = vadd.f32 %v1326_v6, %v1325_v3  ;;  %v1335_v16 = vrot.slane %v1334_v12, 4 }
 0x102   : > { %v1342_v17 = vsel %vm1341_vm11, %v2919_v14, 0.0  ;;  %v1313_v18 = vadd.f32 %v1312_v9, %v1311_v2  ;;  %v1450_v22 = vsel %vm807_vm3, %v1449_v63, %v1295_v8  ;;  %vm1350_vm12 = vcmp.eq.s32.totalorder %v3007_v55, 9 }
 0x103   : > { %v1320_v21 = vadd.f32 %v1319_v11, %v1318_v20  ;;  %v1343_v23 = vsel %vm469_vm8, %v1342_v17, 0.0  ;;  %v1328_v24 = vrot.slane %v1327_v15, 2  ;;  %v1336_v25 = vadd.f32 %v1335_v16, %v1334_v12 }
 0x104   : > { %v1451_v26 = vsel %vm809_vm4, %v1450_v22, %v1304_v13  ;;  %v1344_v27 = vrot.slane %v1343_v23, 4  ;;  %vm1359_vm13 = vcmp.eq.s32.totalorder %v3007_v55, 10  ;;  %v1351_v33 = vsel %vm1350_vm12, %v2919_v14, 0.0 }
 0x105   : > { %v1321_v28 = vrot.slane %v1320_v21, 1  ;;  %v1452_v29 = vsel %vm811_vm5, %v1451_v26, %v1313_v18  ;;  %v1329_v30 = vadd.f32 %v1328_v24, %v1327_v15  ;;  %v1337_v31 = vrot.slane %v1336_v25, 2 }
 0x106   : > { %v1345_v32 = vadd.f32 %v1344_v27, %v1343_v23  ;;  %v1352_v35 = vsel %vm469_vm8, %v1351_v33, 0.0  ;;  %v1360_v36 = vsel %vm1359_vm13, %v2919_v14, 0.0  ;;  %vm1368_vm14 = vcmp.eq.s32.totalorder %v3007_v55, 11 }
 0x107   : > { %v1322_v34 = vadd.f32 %v1321_v28, %v1320_v21  ;;  %v1330_v37 = vrot.slane %v1329_v30, 1  ;;  %v1338_v38 = vadd.f32 %v1337_v31, %v1336_v25  ;;  %v1353_v40 = vrot.slane %v1352_v35, 4 }
 0x108   : > { %v1346_v39 = vrot.slane %v1345_v32, 2  ;;  %v1361_v42 = vsel %vm469_vm8, %v1360_v36, 0.0  ;;  %v1369_v43 = vsel %vm1368_vm14, %v2919_v14, 0.0  ;;  %vm1377_vm15 = vcmp.eq.s32.totalorder %v3007_v55, 12 }
 0x109   : > { %v1453_v41 = vsel %vm813_vm6, %v1452_v29, %v1322_v34  ;;  %v1331_v44 = vadd.f32 %v1330_v37, %v1329_v30  ;;  %v1339_v45 = vrot.slane %v1338_v38, 1  ;;  %v1354_v47 = vadd.f32 %v1353_v40, %v1352_v35 }
 0x10a   : > { %v1347_v46 = vadd.f32 %v1346_v39, %v1345_v32  ;;  %v1362_v48 = vrot.slane %v1361_v42, 4  ;;  %v1370_v49 = vsel %vm469_vm8, %v1369_v43, 0.0  ;;  %v1378_v50 = vsel %vm1377_vm15, %v2919_v14, 0.0 }
 0x10b   : > { %vm1386_vm0 = vcmp.eq.s32.totalorder %v3007_v55, 13  ;;  %v1340_v51 = vadd.f32 %v1339_v45, %v1338_v38  ;;  %v1454_v52 = vsel %vm815_vm7, %v1453_v41, %v1331_v44  ;;  %v1355_v54 = vrot.slane %v1354_v47, 2 }
 0x10c   : > { %v1348_v53 = vrot.slane %v1347_v46, 1  ;;  %v1363_v56 = vadd.f32 %v1362_v48, %v1361_v42  ;;  %v1371_v57 = vrot.slane %v1370_v49, 4  ;;  %v1379_v58 = vsel %vm469_vm8, %v1378_v50, 0.0 }
 0x10d   : > { %v1387_v59 = vsel %vm1386_vm0, %v2919_v14, 0.0  ;;  %v1455_v60 = vsel %vm817_vm9, %v1454_v52, %v1340_v51  ;;  %v1356_v61 = vadd.f32 %v1355_v54, %v1354_v47  ;;  %v1380_v62 = vrot.slane %v1379_v58, 4 }
 0x10e   : > { %v1349_v19 = vadd.f32 %v1348_v53, %v1347_v46  ;;  %v1466_v63 = vsel %vm469_vm8, %v1455_v60, 0.0  ;;  %v1364_v0 = vrot.slane %v1363_v56, 2  ;;  %v1372_v2 = vadd.f32 %v1371_v57, %v1370_v49 }
 0x10f   : > { %v1388_v20 = vsel %vm469_vm8, %v1387_v59, 0.0  ;;  %1467 = vadd.xlane.f32.xlu1 %v1466_v63  ;;  %v1357_v3 = vrot.slane %v1356_v61, 1  ;;  %v1381_v5 = vadd.f32 %v1380_v62, %v1379_v58  ;;  %vm1395_vm11 = vcmp.eq.s32.totalorder %v3007_v55, 14 }
 0x110   : > { %v1389_v6 = vrot.slane %v1388_v20, 4  ;;  %v1365_v7 = vadd.f32 %v1364_v0, %v1363_v56  ;;  %v1373_v8 = vrot.slane %v1372_v2, 2  ;;  %v1396_v9 = vsel %vm1395_vm11, %v2919_v14, 0.0 }
 0x111   : > { %vm1404_vm12 = vcmp.eq.s32.totalorder %v3007_v55, 15  ;;  %v1358_v11 = vadd.f32 %v1357_v3, %v1356_v61  ;;  %v1382_v12 = vrot.slane %v1381_v5, 2  ;;  %v1397_v15 = vsel %vm469_vm8, %v1396_v9, 0.0 }
 0x112   : > { %v1390_v13 = vadd.f32 %v1389_v6, %v1388_v20  ;;  %v1366_v16 = vrot.slane %v1365_v7, 1  ;;  %v1374_v17 = vadd.f32 %v1373_v8, %v1372_v2  ;;  %v1398_v18 = vrot.slane %v1397_v15, 4 }
 0x113   : > { %v1405_v21 = vsel %vm1404_vm12, %v2919_v14, 0.0  ;;  %v1383_v22 = vadd.f32 %v1382_v12, %v1381_v5  ;;  %v1456_v25 = vsel %vm805_vm1, %v1349_v19, %v1358_v11  ;;  %vm1413_vm13 = vcmp.eq.s32.totalorder %v3007_v55, 16 }
 0x114   : > { %v1391_v23 = vrot.slane %v1390_v13, 2  ;;  %v1406_v24 = vsel %vm469_vm8, %v1405_v21, 0.0  ;;  %v1367_v26 = vadd.f32 %v1366_v16, %v1365_v7  ;;  %v1375_v27 = vrot.slane %v1374_v17, 1 }
 0x115   : > { %v1399_v28 = vadd.f32 %v1398_v18, %v1397_v15  ;;  %v1407_v29 = vrot.slane %v1406_v24, 4  ;;  %v1384_v30 = vrot.slane %v1383_v22, 1  ;;  %vm1422_vm14 = vcmp.eq.s32.totalorder %v3007_v55, 17 }
 0x116   : > { %v1392_v31 = vadd.f32 %v1391_v23, %v1390_v13  ;;  %v1376_v32 = vadd.f32 %v1375_v27, %v1374_v17  ;;  %v1457_v35 = vsel %vm807_vm3, %v1456_v25, %v1367_v26  ;;  %v1414_v38 = vsel %vm1413_vm13, %v2919_v14, 0.0 }
 0x117   : > { %v1400_v33 = vrot.slane %v1399_v28, 2  ;;  %v1408_v34 = vadd.f32 %v1407_v29, %v1406_v24  ;;  %v1385_v36 = vadd.f32 %v1384_v30, %v1383_v22  ;;  %v1423_v39 = vsel %vm1422_vm14, %v2919_v14, 0.0 }
 0x118   : > { %v1393_v37 = vrot.slane %v1392_v31, 1  ;;  %v1458_v42 = vsel %vm809_vm4, %v1457_v35, %v1376_v32  ;;  %v1415_v43 = vsel %vm469_vm8, %v1414_v38, 0.0  ;;  %v1424_v47 = vsel %vm469_vm8, %v1423_v39, 0.0 }
 0x119   : > { %v1401_v40 = vadd.f32 %v1400_v33, %v1399_v28  ;;  %v1409_v41 = vrot.slane %v1408_v34, 2  ;;  %v1459_v45 = vsel %vm811_vm5, %v1458_v42, %v1385_v36  ;;  %v1416_v46 = vrot.slane %v1415_v43, 4 }
 0x11a   : > { %v1394_v44 = vadd.f32 %v1393_v37, %v1392_v31  ;;  %v1425_v50 = vrot.slane %v1424_v47, 4  ;;  %vm1431_vm15 = vcmp.eq.s32.totalorder %v3007_v55, 18  ;;  %vm1440_vm0 = vcmp.eq.s32.totalorder %v3007_v55, 19 }
 0x11b   : > { %v1402_v48 = vrot.slane %v1401_v40, 1  ;;  %v1410_v49 = vadd.f32 %v1409_v41, %v1408_v34  ;;  %v1417_v52 = vadd.f32 %v1416_v46, %v1415_v43  ;;  %v1432_v53 = vsel %vm1431_vm15, %v2919_v14, 0.0 }
 0x11c   : > { %v1460_v51 = vsel %vm813_vm6, %v1459_v45, %v1394_v44  ;;  %v1426_v57 = vadd.f32 %v1425_v50, %v1424_v47  ;;  %v1433_v58 = vsel %vm469_vm8, %v1432_v53, 0.0  ;;  %v1441_v19 = vsel %vm1440_vm0, %v2919_v14, 0.0 }
 0x11d   : > { %v1403_v54 = vadd.f32 %v1402_v48, %v1401_v40  ;;  %v1411_v56 = vrot.slane %v1410_v49, 1  ;;  %v1418_v59 = vrot.slane %v1417_v52, 2  ;;  %v1434_v60 = vrot.slane %v1433_v58, 4 }
 0x11e   : > { %v1427_v63 = vrot.slane %v1426_v57, 2  ;;  %v1442_v0 = vsel %vm469_vm8, %v1441_v19, 0.0  ;;  %v2633_v11 = vmov 0   ;;  %v843_v29 = vlaneseq }
 0x11f   : > { %v1412_v61 = vadd.f32 %v1411_v56, %v1410_v49  ;;  %v1461_v62 = vsel %vm815_vm7, %v1460_v51, %v1403_v54  ;;  %v1419_v2 = vadd.f32 %v1418_v59, %v1417_v52  ;;  %v1435_v20 = vadd.f32 %v1434_v60, %v1433_v58  ;;  %2292 = vset.pattern.permute.xlu1 %v2633_v11 }
 0x120   : > { %v1443_v3 = vrot.slane %v1442_v0, 4  ;;  %v1428_v5 = vadd.f32 %v1427_v63, %v1426_v57  ;;  %2291 = vset.pattern.permute.xlu0 %v2633_v11  ;;  %v3098_v30 = vshrl.u32 %v843_v29, 7  ;;  %v2634_v31 = vmov 1966171168  }
 0x121   : > { %v1462_v55 = vsel %vm817_vm9, %v1461_v62, %v1412_v61  ;;  %v1420_v7 = vrot.slane %v1419_v2, 1  ;;  %v1436_v8 = vrot.slane %v1435_v20, 2  ;;  %v928_v32 = vunpack.c.l.s4 %v2634_v31 }
 0x122   : > { %v1469_v6 = vsel %vm469_vm8, %v1462_v55, 0.0  ;;  %v1444_v9 = vadd.f32 %v1443_v3, %v1442_v0  ;;  %v1429_v12 = vrot.slane %v1428_v5, 1  ;;  %v3101_v33 = vsub.s32 0, %v3098_v30 }
 0x123   : > { %1470 = vadd.xlane.f32.xlu1 %v1469_v6  ;;  %v1421_v13 = vadd.f32 %v1420_v7, %v1419_v2  ;;  %v1437_v15 = vadd.f32 %v1436_v8, %v1435_v20  ;;  %v3104_v34 = vsub.s32 1, %v3098_v30  ;;  %v3107_v35 = vsub.s32 2, %v3098_v30 }
 0x124   : > { %v1445_v16 = vrot.slane %v1444_v9, 2  ;;  %v1430_v17 = vadd.f32 %v1429_v12, %v1428_v5  ;;  %v3110_v36 = vsub.s32 3, %v3098_v30  ;;  %v929_v37 = vunpack.c.0.s8 %v928_v32 }
 0x125   : > { %v1438_v18 = vrot.slane %v1437_v15, 1  ;;  %v3113_v39 = vsub.s32 4, %v3098_v30  ;;  %v3116_v40 = vsub.s32 5, %v3098_v30  ;;  %v3119_v41 = vsub.s32 6, %v3098_v30 }
 0x126   : > { %v1446_v21 = vadd.f32 %v1445_v16, %v1444_v9  ;;  %v1463_v22 = vsel %vm805_vm1, %v1421_v13, %v1430_v17  ;;  %v3122_v42 = vsub.s32 7, %v3098_v30  ;;  %v3133_v51 = vsub.s32 %v929_v37, %v3098_v30 }
 0x127   : > { %v1439_v23 = vadd.f32 %v1438_v18, %v1437_v15  ;;  %vm1116_vm1 = vcmp.ge.f32.partialorder %v2919_v14, 0.3 }
 0x128   : > { %v1447_v24 = vrot.slane %v1446_v21, 1 }
 0x129   : > { %v1464_v26 = vsel %vm807_vm3, %v1463_v22, %v1439_v23 }
 0x12a   : > { %v1448_v25 = vadd.f32 %v1447_v24, %v1446_v21 }
 0x12c   : > { %v1465_v27 = vsel %vm809_vm4, %v1464_v26, %v1448_v25 }
 0x12d   : > { %v1472_v28 = vsel %vm835_vm10, %v1465_v27, 0.0 }
 0x12e   : > { %1473 = vadd.xlane.f32.xlu1 %v1472_v28 }
 0x168   : > { %v831_v38 = vpop.xlane.xlu0 %830 }
 0x169   : > { %v846_v43 = vrot.slane %v831_v38, %v3101_v33  ;;  %v850_v44 = vrot.slane %v831_v38, %v3104_v34  ;;  %v854_v45 = vrot.slane %v831_v38, %v3107_v35  ;;  %v858_v46 = vrot.slane %v831_v38, %v3110_v36 }
 0x16a   : > { %v862_v47 = vrot.slane %v831_v38, %v3113_v39  ;;  %v866_v48 = vrot.slane %v831_v38, %v3116_v40  ;;  %v870_v49 = vrot.slane %v831_v38, %v3119_v41  ;;  %v874_v50 = vrot.slane %v831_v38, %v3122_v42 }
 0x16b   : > { %v923_v52 = vcombine.low %v846_v43, %v850_v44  ;;  %v924_v53 = vcombine.low %v854_v45, %v858_v46 }
 0x16c   : > { %v925_v54 = vcombine.low %v862_v47, %v866_v48  ;;  %v926_v56 = vcombine.low %v870_v49, %v874_v50 }
 0x16d   : > { %v933_v57 = vrot.slane %v923_v52, %v3133_v51  ;;  %v940_v58 = vrot.slane %v924_v53, %v3133_v51 }
 0x16e   : > { %v947_v59 = vrot.slane %v925_v54, %v3133_v51  ;;  %v954_v60 = vrot.slane %v926_v56, %v3133_v51 }
 0x16f   : > { %v955_v19 = vcombine.low %v933_v57, %v940_v58 }
 0x170   : > { %v956_v61 = vcombine.low %v947_v59, %v954_v60 }
 0x171   : > { %v963_v62 = vrot.slane %v955_v19, %v3133_v51 }
 0x172   : > { %v970_v63 = vrot.slane %v956_v61, %v3133_v51 }
 0x174   : > { %v971_v0 = vcombine.low %v963_v62, %v970_v63 }
 0x176   : > { %1046 = vperm.xlu0 %2291, %v971_v0  }
 0x17d   : > { %v834_v2 = vpop.xlane.xlu0 %833 }
 0x17e   : > { %v878_v20 = vrot.slane %v834_v2, %v3101_v33  ;;  %v882_v3 = vrot.slane %v834_v2, %v3104_v34  ;;  %v886_v55 = vrot.slane %v834_v2, %v3107_v35  ;;  %v890_v5 = vrot.slane %v834_v2, %v3110_v36 }
 0x17f   : > { %v894_v6 = vrot.slane %v834_v2, %v3113_v39  ;;  %v898_v7 = vrot.slane %v834_v2, %v3116_v40  ;;  %v902_v8 = vrot.slane %v834_v2, %v3119_v41  ;;  %v906_v9 = vrot.slane %v834_v2, %v3122_v42 }
 0x180   : > { %v972_v11 = vcombine.low %v878_v20, %v882_v3  ;;  %v973_v12 = vcombine.low %v886_v55, %v890_v5 }
 0x181   : > { %v974_v13 = vcombine.low %v894_v6, %v898_v7  ;;  %v975_v15 = vcombine.low %v902_v8, %v906_v9 }
 0x182   : > { %v982_v16 = vrot.slane %v972_v11, %v3133_v51  ;;  %v989_v17 = vrot.slane %v973_v12, %v3133_v51 }
 0x183   : > { %v996_v18 = vrot.slane %v974_v13, %v3133_v51  ;;  %v1003_v21 = vrot.slane %v975_v15, %v3133_v51 }
 0x184   : > { %v1004_v31 = vcombine.low %v982_v16, %v989_v17 }
 0x185   : > { %v1005_v32 = vcombine.low %v996_v18, %v1003_v21 }
 0x186   : > { %v1012_v46 = vrot.slane %v1004_v31, %v3133_v51 }
 0x187   : > { %v1019_v47 = vrot.slane %v1005_v32, %v3133_v51 }
 0x188   : > { %v838_v22 = vpop.xlane.xlu0 %837 }
 0x189   : > { %v910_v23 = vrot.slane %v838_v22, %v3101_v33  ;;  %v914_v24 = vrot.slane %v838_v22, %v3104_v34  ;;  %v918_v25 = vrot.slane %v838_v22, %v3107_v35  ;;  %v922_v26 = vrot.slane %v838_v22, %v3110_v36 }
 0x18a   : > { %v1020_v52 = vcombine.low %v1012_v46, %v1019_v47 }
 0x18b   : > { %v1021_v27 = vcombine.low %v910_v23, %v914_v24  ;;  %v1022_v28 = vcombine.low %v918_v25, %v922_v26 }
 0x18d   : > { %v1029_v37 = vrot.slane %v1021_v27, %v3133_v51  ;;  %v1036_v38 = vrot.slane %v1022_v28, %v3133_v51 }
 0x18e   : > { %v541_v43 = vpop.f32.mrb[0].mxu0 }
 0x18f   : > { %v2122_v44 = vpop.f32.mrb[1].mxu0  ;;  %2128 = vmatmul.mubr.msk.f32.vlgmr.msra.gmra.mrb[0].mxu1 %vm469_vm8, %v541_v43  ;;  %v1037_v45 = vcombine.low %v1029_v37, %v1036_v38 }
 0x190   : > { %2147 = vmatpush3.bf16.msra.mxu1 %v2911_v1  ;;  %2139 = vmatprep.mubr.msk.f32.mxu1 %vm2631_vm2, %v2630_v4  ;;  %vm466_vm2 = vcmp.ge.f32.partialorder %v2914_v10, 0.3 }
 0x191   : > { %v1044_v48 = vrot.slane %v1037_v45, %v3133_v51 }
 0x192   : > { %v1186_v49 = vpop.f32.mrb[2].mxu0 }
 0x193   : > { %v2134_v50 = vpop.f32.mrb[3].mxu0  ;;  %2140 = vmatmul.mubr.msk.f32.vlgmr.msra.gmra.mrb[2].mxu1 %vm469_vm8, %v1186_v49  ;;  %1052 = vperm.xlu1 %2292, %v1044_v48  }
 0x197   : > { %1049 = vperm.xlu1 %2292, %v1020_v52  }
 0x19c   : > { %v1468_v53 = vpop.xlane.xlu1 %1467 }
 0x19d   : > { %v1482_v54 = vrot.slane %v1468_v53, %v3101_v33  ;;  %v1486_v56 = vrot.slane %v1468_v53, %v3104_v34  ;;  %v1490_v57 = vrot.slane %v1468_v53, %v3107_v35  ;;  %v1494_v1 = vrot.slane %v1468_v53, %v3110_v36 }
 0x19e   : > { %v1498_v58 = vrot.slane %v1468_v53, %v3113_v39  ;;  %v1502_v59 = vrot.slane %v1468_v53, %v3116_v40  ;;  %v1506_v60 = vrot.slane %v1468_v53, %v3119_v41  ;;  %v1510_v19 = vrot.slane %v1468_v53, %v3122_v42 }
 0x19f   : > { %v1559_v61 = vcombine.low %v1482_v54, %v1486_v56  ;;  %v1560_v62 = vcombine.low %v1490_v57, %v1494_v1 }
 0x1a0   : > { %v1561_v63 = vcombine.low %v1498_v58, %v1502_v59  ;;  %v1562_v0 = vcombine.low %v1506_v60, %v1510_v19 }
 0x1a1   : > { %v1569_v2 = vrot.slane %v1559_v61, %v3133_v51  ;;  %v1576_v20 = vrot.slane %v1560_v62, %v3133_v51 }
 0x1a2   : > { %v1583_v3 = vrot.slane %v1561_v63, %v3133_v51  ;;  %v1590_v55 = vrot.slane %v1562_v0, %v3133_v51 }
 0x1a3   : > { %v1591_v5 = vcombine.low %v1569_v2, %v1576_v20 }
 0x1a4   : > { %v1592_v6 = vcombine.low %v1583_v3, %v1590_v55 }
 0x1a5   : > { %v1599_v7 = vrot.slane %v1591_v5, %v3133_v51 }
 0x1a6   : > { %v1606_v8 = vrot.slane %v1592_v6, %v3133_v51 }
 0x1a8   : > { %v1607_v9 = vcombine.low %v1599_v7, %v1606_v8 }
 0x1aa   : > { %1682 = vperm.xlu1 %2292, %v1607_v9  }
 0x1b0   : > { %v1471_v11 = vpop.xlane.xlu1 %1470 }
 0x1b1   : > { %v1514_v12 = vrot.slane %v1471_v11, %v3101_v33  ;;  %v1518_v13 = vrot.slane %v1471_v11, %v3104_v34  ;;  %v1522_v15 = vrot.slane %v1471_v11, %v3107_v35  ;;  %v1526_v16 = vrot.slane %v1471_v11, %v3110_v36 }
 0x1b2   : > { %v1530_v17 = vrot.slane %v1471_v11, %v3113_v39  ;;  %v1534_v18 = vrot.slane %v1471_v11, %v3116_v40  ;;  %v1538_v21 = vrot.slane %v1471_v11, %v3119_v41  ;;  %v1542_v22 = vrot.slane %v1471_v11, %v3122_v42 }
 0x1b3   : > { %v1608_v23 = vcombine.low %v1514_v12, %v1518_v13  ;;  %v1609_v24 = vcombine.low %v1522_v15, %v1526_v16 }
 0x1b4   : > { %v1610_v25 = vcombine.low %v1530_v17, %v1534_v18  ;;  %v1611_v26 = vcombine.low %v1538_v21, %v1542_v22 }
 0x1b5   : > { %v1618_v27 = vrot.slane %v1608_v23, %v3133_v51  ;;  %v1625_v28 = vrot.slane %v1609_v24, %v3133_v51 }
 0x1b6   : > { %v1632_v31 = vrot.slane %v1610_v25, %v3133_v51  ;;  %v1639_v32 = vrot.slane %v1611_v26, %v3133_v51 }
 0x1b7   : > { %v1640_v37 = vcombine.low %v1618_v27, %v1625_v28 }
 0x1b8   : > { %v1641_v39 = vcombine.low %v1632_v31, %v1639_v32 }
 0x1b9   : > { %v1648_v40 = vrot.slane %v1640_v37, %v3133_v51 }
 0x1ba   : > { %v1655_v41 = vrot.slane %v1641_v39, %v3133_v51 }
 0x1bb   : > { %v1474_v38 = vpop.xlane.xlu1 %1473 }
 0x1bc   : > { %v1546_v42 = vrot.slane %v1474_v38, %v3101_v33  ;;  %v1550_v43 = vrot.slane %v1474_v38, %v3104_v34  ;;  %v1554_v44 = vrot.slane %v1474_v38, %v3107_v35  ;;  %v1558_v45 = vrot.slane %v1474_v38, %v3110_v36 }
 0x1bd   : > { %v1656_v46 = vcombine.low %v1648_v40, %v1655_v41  ;;  %v2084_v35 = vsel %vm466_vm2, 1.0, %v2630_v4  ;;  %v2089_v36 = vsel %vm1116_vm1, 1.0, %v2630_v4 }
 0x1be   : > { %v1657_v47 = vcombine.low %v1546_v42, %v1550_v43  ;;  %v1658_v48 = vcombine.low %v1554_v44, %v1558_v45  ;;  %470 = vst.msk [vmem:[%s2886_s21] sm:$0xff] %vm469_vm8, %v2084_v35  ;;  %1119 = vst.msk [vmem:[%s2893_s13] sm:$0xff] %vm469_vm8, %v2089_v36 }
 0x1bf   : > { %1685 = vperm.xlu1 %2292, %v1656_v46  }
 0x1c0   : > { %v1665_v49 = vrot.slane %v1657_v47, %v3133_v51  ;;  %v1672_v50 = vrot.slane %v1658_v48, %v3133_v51 }
 0x1c2   : > { %v1673_v33 = vcombine.low %v1665_v49, %v1672_v50 }
 0x1c4   : > { %v1680_v34 = vrot.slane %v1673_v33, %v3133_v51 }
 0x1c6   : > { %1688 = vperm.xlu1 %2292, %v1680_v34  }
 0x1c7   : > { %2358 = shalt.err (!%p2355_p13)
}
 0x1c8   : > { %s2359_s13 = scalar_lea.hbm %s3220_s25, 128  ;;  %s2363_s2 = scalar_lea.hbm %s3502_s8, 512 }
 0x1c9   : > { %p2360_p0 = scmp.ne.s32.totalorder %s3220_s25, %s2359_s13  ;;  %p2364_p3 = scmp.lt.u32.totalorder %s3220_s25, %s3502_s8 }
 0x1ca   : > { %p2365_p12 = scmp.lt.u32.totalorder %s2363_s2, %s2359_s13  ;;  %p2367_p2 = scmp.lt.u32.totalorder %s2359_s13, %s3220_s25 }
 0x1cb   : > { %p2361_p4 = pnand %p2360_p0, %p3543_p10 }
 0x1cc   : > { %p2366_p7 = por %p2365_p12, %p2364_p3 }
 0x1cd   : > { %p2362_p6 = pneg %p2361_p4 }
 0x1ce   : > { %p2368_p9 = por %p2367_p2, %p2366_p7 }
 0x1d0   : > { %p2369_p8 = pnand %p2368_p9, %p2362_p6 }
 0x1d2   : > { %2372 = shalt.err (!%p2369_p8)
}
 0x1d3   : > { %2162 = dma.vmem_to_hbm [thread:$0]  (%p3543_p10), %s1828_s6, 128, %s3220_s25, %s1745_s22   ;;  %v1055_v4 = vand.u32 127, %v843_v29  ;;  %vm1065_vm8 = vcmask 130112   ;;  %vm1072_vm3 = vcmask 195712   ;;  %v839_v61 = vld [vmem:[%s2884_s27] sm:$0x1] }
 0x1d4   : > { %s1726_s1 = sand.u32 1, %s2742_s16   ;;  %s2099_s25 = sshll.u32 %s2611_s12, 4  ;;  %vm1090_vm4 = vcmask 155648  }
 0x1d5   : > { %v1067_v10 = vadd.s32 4294967280, %v1055_v4  ;;  %v1060_v14 = vadd.s32 4294967288, %v1055_v4  ;;  %v3243_v52 = vsub.s32 %v1055_v4, %v3098_v30  ;;  %s1771_s6 = sshll.u32 %s2884_s27, 4  ;;  %s1786_s22 = sshll.u32 %s2886_s21, 4  ;;  %s3270_s6 = int_to_ptr.vmem [resolvable:$true] %s1771_s6  ;;  %s3279_s22 = int_to_ptr.vmem [resolvable:$true] %s1786_s22 }
 0x1d6   : > { %s3268_s30 = scalar_lea.hbm %s3498_s4, %s2099_s25  ;;  %s3277_s23 = scalar_lea.hbm %s3499_s5, %s2101_s14 }
 0x1d7   : > { %v3246_v53 = vsub.s32 %v1067_v10, %v3098_v30  ;;  %v3249_v57 = vsub.s32 %v1060_v14, %v3098_v30  ;;  %s3285_s21 = scalar_lea.sflag [#allocation7], %s1726_s1  ;;  %s2373_s11 = scalar_lea.vmem %s3270_s6, 16 }
 0x1d8   : > { %p2374_p1 = scmp.ne.s32.totalorder %s3270_s6, %s2373_s11  ;;  %p3544_p5 = scmp.ne.s32.totalorder %s3530_s17, 0 }
 0x1d9   : > { %s2636_s7 = smov [#allocation6]  }
 0x1da   : > { %p2375_p11 = pnand %p2374_p1, %p3544_p5  ;;  %s2377_s26 = sshll.u32 %s2636_s7, 4  ;;  %s2378_s26 = int_to_ptr.vmem [resolvable:$false] %s2377_s26 }
 0x1db   : > { %s2379_s13 = scalar_lea.vmem %s2378_s26, 32  ;;  %p2380_p0 = scmp.lt.s32.totalorder %s3270_s6, %s2378_s26 }
 0x1dc   : > { %p2376_p13 = pneg %p2375_p11  ;;  %p2381_p4 = scmp.lt.s32.totalorder %s2379_s13, %s2373_s11 }
 0x1de   : > { %p2382_p6 = por %p2381_p4, %p2380_p0 }
 0x1e0   : > { %p2383_p3 = pnand %p2382_p6, %p2376_p13 }
 0x1f5   : > { %v1047_v56 = vpop.permute.xlu0 %1046 }
 0x1f6   : > { %v1059_v29 = vrot.slane %v1047_v56, %v3243_v52 }
 0x212   : > { %v1053_v54 = vpop.permute.xlu1 %1052 }
 0x213   : > { %v1071_v1 = vrot.slane %v1053_v54, %v3246_v53 }
 0x216   : > { %v1050_v58 = vpop.permute.xlu1 %1049 }
 0x217   : > { %v1064_v59 = vrot.slane %v1050_v58, %v3249_v57 }
 0x219   : > { %v1066_v60 = vsel %vm1065_vm8, %v1064_v59, %v1059_v29 }
 0x21a   : > { %v1073_v19 = vsel %vm1072_vm3, %v1071_v1, %v1066_v60 }
 0x21b   : > { %v1080_v30 = vrot.slane %v1073_v19, %v3133_v51 }
 0x21d   : > { %v1087_v62 = vrot.slane %v1080_v30, %v3133_v51 }
 0x21f   : > { %v1089_v63 = vadd.f32 %v1087_v62, %v839_v61 }
 0x221   : > { %1091 = vst.msk [vmem:[%s2884_s27] sm:$0x1] %vm1090_vm4, %v1089_v63 }
 0x222   : > { %2386 = shalt.err (!%p2383_p3)
}
 0x223   : > { %s2387_s27 = scalar_lea.hbm %s3268_s30, 16  ;;  %s2391_s2 = scalar_lea.hbm %s3498_s4, 32 }
 0x224   : > { %p2388_p12 = scmp.ne.s32.totalorder %s3268_s30, %s2387_s27  ;;  %p2392_p9 = scmp.lt.u32.totalorder %s3268_s30, %s3498_s4 }
 0x225   : > { %p2393_p8 = scmp.lt.u32.totalorder %s2391_s2, %s2387_s27  ;;  %p2395_p11 = scmp.lt.u32.totalorder %s2387_s27, %s3268_s30 }
 0x226   : > { %p2389_p7 = pnand %p2388_p12, %p3544_p5 }
 0x227   : > { %p2394_p1 = por %p2393_p8, %p2392_p9 }
 0x228   : > { %p2390_p2 = pneg %p2389_p7 }
 0x229   : > { %p2396_p13 = por %p2395_p11, %p2394_p1 }
 0x22b   : > { %p2397_p0 = pnand %p2396_p13, %p2390_p2 }
 0x22d   : > { %2400 = shalt.err (!%p2397_p0)
}
 0x22e   : > { %2158 = dma.vmem_to_hbm [thread:$0]  (%p3544_p5), %s3270_s6, 16, %s3268_s30, %s3285_s21  }
 0x22f   : > { %s2401_s11 = scalar_lea.vmem %s3279_s22, 128  ;;  %s2637_s13 = smov [#allocation8]  }
 0x230   : > { %p2402_p4 = scmp.ne.s32.totalorder %s3279_s22, %s2401_s11  ;;  %s2405_s27 = sshll.u32 %s2637_s13, 4  ;;  %s2406_s27 = int_to_ptr.vmem [resolvable:$false] %s2405_s27 }
 0x231   : > { %s2407_s14 = scalar_lea.vmem %s2406_s27, 256  ;;  %p2408_p12 = scmp.lt.s32.totalorder %s3279_s22, %s2406_s27 }
 0x232   : > { %p2403_p6 = pnand %p2402_p4, %p3543_p10  ;;  %p2409_p7 = scmp.lt.s32.totalorder %s2407_s14, %s2401_s11 }
 0x234   : > { %p2404_p3 = pneg %p2403_p6  ;;  %p2410_p2 = por %p2409_p7, %p2408_p12 }
 0x236   : > { %p2411_p9 = pnand %p2410_p2, %p2404_p3 }
 0x238   : > { %2414 = shalt.err (!%p2411_p9)
}
 0x239   : > { %s2415_s6 = scalar_lea.hbm %s3277_s23, 128  ;;  %s2419_s2 = scalar_lea.hbm %s3499_s5, 512 }
 0x23a   : > { %p2416_p8 = scmp.ne.s32.totalorder %s3277_s23, %s2415_s6  ;;  %p2420_p13 = scmp.lt.u32.totalorder %s3277_s23, %s3499_s5 }
 0x23b   : > { %p2421_p0 = scmp.lt.u32.totalorder %s2419_s2, %s2415_s6  ;;  %p2423_p6 = scmp.lt.u32.totalorder %s2415_s6, %s3277_s23 }
 0x23c   : > { %p2417_p1 = pnand %p2416_p8, %p3543_p10 }
 0x23d   : > { %p2422_p4 = por %p2421_p0, %p2420_p13 }
 0x23e   : > { %p2418_p11 = pneg %p2417_p1 }
 0x23f   : > { %p2424_p3 = por %p2423_p6, %p2422_p4 }
 0x241   : > { %p2425_p12 = pnand %p2424_p3, %p2418_p11 }
 0x243   : > { %2428 = shalt.err (!%p2425_p12)
}
 0x244   : > { %2159 = dma.vmem_to_hbm [thread:$0]  (%p3543_p10), %s3279_s22, 128, %s3277_s23, %s3285_s21   ;;  %v1683_v0 = vpop.permute.xlu1 %1682  ;;  %v1475_v9 = vld [vmem:[%s2891_s0] sm:$0x1]  ;;  %v618_v13 = vld [vmem:[%s2881_s24] sm:$0xf]  ;;  %vm620_vm5 = vcmask 27648  }
 0x245   : > { %v1693_v20 = vrot.slane %v1683_v0, %v3243_v52  ;;  %s2098_s19 = sshll.u32 %s2611_s12, 6  ;;  %s1758_s22 = sshll.u32 %s2881_s24, 4  ;;  %s3351_s22 = int_to_ptr.vmem [resolvable:$true] %s1758_s22 }
 0x246   : > { %s3349_s11 = scalar_lea.hbm %s3497_s3, %s2098_s19  ;;  %s1799_s13 = sshll.u32 %s2888_s20, 4  ;;  %s3389_s13 = int_to_ptr.vmem [resolvable:$true] %s1799_s13 }
 0x247   : > { %s1812_s27 = sshll.u32 %s2891_s0, 4  ;;  %s1722_s14 = scalar_lea.sflag [#allocation4], %s2870_s29  ;;  %s3400_s27 = int_to_ptr.vmem [resolvable:$true] %s1812_s27 }
 0x248   : > { %v1686_v2 = vpop.permute.xlu1 %1685  ;;  %s2429_s6 = scalar_lea.vmem %s3351_s22, 64  ;;  %s2638_s30 = smov [#allocation5]  }
 0x249   : > { %v1697_v3 = vrot.slane %v1686_v2, %v3249_v57  ;;  %p2430_p10 = scmp.ne.s32.totalorder %s3351_s22, %s2429_s6  ;;  %s2433_s18 = sshll.u32 %s2638_s30, 4  ;;  %s2434_s18 = int_to_ptr.vmem [resolvable:$false] %s2433_s18 }
 0x24a   : > { %s2435_s2 = scalar_lea.vmem %s2434_s18, 128  ;;  %p2436_p9 = scmp.lt.s32.totalorder %s3351_s22, %s2434_s18 }
 0x24b   : > { %v1698_v55 = vsel %vm1065_vm8, %v1697_v3, %v1693_v20  ;;  %p2431_p7 = pnand %p2430_p10, %p3544_p5  ;;  %p2437_p8 = scmp.lt.s32.totalorder %s2435_s2, %s2429_s6 }
 0x24c   : > { %v1689_v5 = vpop.permute.xlu1 %1688 }
 0x24d   : > { %v1702_v6 = vrot.slane %v1689_v5, %v3246_v53  ;;  %p2432_p2 = pneg %p2431_p7  ;;  %p2438_p1 = por %p2437_p8, %p2436_p9 }
 0x24f   : > { %v1703_v7 = vsel %vm1072_vm3, %v1702_v6, %v1698_v55  ;;  %p2439_p11 = pnand %p2438_p1, %p2432_p2 }
 0x250   : > { %v1710_v8 = vrot.slane %v1703_v7, %v3133_v51 }
 0x252   : > { %v1717_v11 = vrot.slane %v1710_v8, %v3133_v51  ;;  %v1263_v51 = vld [vmem:[%s2888_s20] sm:$0xf] }
 0x254   : > { %v1719_v12 = vadd.f32 %v1717_v11, %v1475_v9 }
 0x256   : > { %1720 = vst.msk [vmem:[%s2891_s0] sm:$0x1] %vm1090_vm4, %v1719_v12 }
 0x262   : > { %v614_v15 = vpop.f32.mrb[0].mxu1 }
 0x263   : > { %v619_v16 = vadd.f32 %v618_v13, %v614_v15  ;;  %v2129_v17 = vpop.f32.mrb[1].mxu1 }
 0x265   : > { %621 = vst.msk [vmem:[%s2881_s24] sm:$0xf] %vm620_vm5, %v619_v16 }
 0x266   : > { %v1259_v18 = vpop.f32.mrb[2].mxu1 }
 0x267   : > { %2442 = shalt.err (!%p2439_p11)
}
 0x268   : > { %s2443_s29 = scalar_lea.hbm %s3349_s11, 64  ;;  %s2447_s26 = scalar_lea.hbm %s3497_s3, 128 }
 0x269   : > { %p2444_p13 = scmp.ne.s32.totalorder %s3349_s11, %s2443_s29  ;;  %p2448_p6 = scmp.lt.u32.totalorder %s3349_s11, %s3497_s3 }
 0x26a   : > { %p2449_p3 = scmp.lt.u32.totalorder %s2447_s26, %s2443_s29  ;;  %p2451_p10 = scmp.lt.u32.totalorder %s2443_s29, %s3349_s11 }
 0x26b   : > { %p2445_p0 = pnand %p2444_p13, %p3544_p5 }
 0x26c   : > { %p2450_p12 = por %p2449_p3, %p2448_p6 }
 0x26d   : > { %p2446_p4 = pneg %p2445_p0 }
 0x26e   : > { %p2452_p7 = por %p2451_p10, %p2450_p12 }
 0x270   : > { %p2453_p2 = pnand %p2452_p7, %p2446_p4 }
 0x272   : > { %2456 = shalt.err (!%p2453_p2)
}
 0x273   : > { %2157 = dma.vmem_to_hbm [thread:$0]  (%p3544_p5), %s3351_s22, 64, %s3349_s11, %s1722_s14   ;;  %v1264_v21 = vadd.f32 %v1263_v51, %v1259_v18  ;;  %v2141_v22 = vpop.f32.mrb[3].mxu1 }
 0x274   : > { %s3545_s18 = sld [smem:[#allocation34_spill]]  ;;  %s3546_s7 = sld [smem:[#allocation35_spill]] }
 0x275   : > { %1265 = vst.msk [vmem:[%s2888_s20] sm:$0xf] %vm620_vm5, %v1264_v21  ;;  %s2457_s22 = scalar_lea.vmem %s3389_s13, 64  ;;  %s2639_s12 = smov [#allocation9]  }
 0x276   : > { %p2458_p9 = scmp.ne.s32.totalorder %s3389_s13, %s2457_s22  ;;  %s2461_s11 = sshll.u32 %s2639_s12, 4  ;;  %s2462_s11 = int_to_ptr.vmem [resolvable:$false] %s2461_s11 }
 0x277   : > { %s2463_s14 = scalar_lea.vmem %s2462_s11, 128  ;;  %p2464_p11 = scmp.lt.s32.totalorder %s3389_s13, %s2462_s11 }
 0x278   : > { %p2459_p8 = pnand %p2458_p9, %p3544_p5  ;;  %p2465_p13 = scmp.lt.s32.totalorder %s2463_s14, %s2457_s22 }
 0x27a   : > { %s3385_s2 = scalar_lea.hbm %s3545_s18, %s2098_s19  ;;  %s3396_s26 = scalar_lea.hbm %s3546_s7, %s2099_s25 }
 0x27b   : > { %s3406_s19 = scalar_lea.sflag [#allocation10], %s1726_s1  ;;  %p2460_p1 = pneg %p2459_p8 }
 0x27c   : > { %p2466_p0 = por %p2465_p13, %p2464_p11 }
 0x27e   : > { %p2467_p4 = pnand %p2466_p0, %p2460_p1 }
 0x280   : > { %2470 = shalt.err (!%p2467_p4)
}
 0x281   : > { %s2471_s0 = scalar_lea.hbm %s3385_s2, 64  ;;  %s2475_s1 = scalar_lea.hbm %s3545_s18, 128 }
 0x282   : > { %p2472_p6 = scmp.ne.s32.totalorder %s3385_s2, %s2471_s0  ;;  %p2476_p10 = scmp.lt.u32.totalorder %s3385_s2, %s3545_s18 }
 0x283   : > { %p2477_p7 = scmp.lt.u32.totalorder %s2475_s1, %s2471_s0  ;;  %p2479_p9 = scmp.lt.u32.totalorder %s2471_s0, %s3385_s2 }
 0x284   : > { %p2473_p3 = pnand %p2472_p6, %p3544_p5 }
 0x285   : > { %p2478_p2 = por %p2477_p7, %p2476_p10 }
 0x286   : > { %p2474_p12 = pneg %p2473_p3 }
 0x287   : > { %p2480_p8 = por %p2479_p9, %p2478_p2 }
 0x289   : > { %p2481_p1 = pnand %p2480_p8, %p2474_p12 }
 0x28b   : > { %2484 = shalt.err (!%p2481_p1)
}
 0x28c   : > { %2160 = dma.vmem_to_hbm [thread:$0]  (%p3544_p5), %s3389_s13, 64, %s3385_s2, %s3406_s19  }
 0x28d   : > { %s2485_s21 = scalar_lea.vmem %s3400_s27, 16  ;;  %s2640_s6 = smov [#allocation11]  }
 0x28e   : > { %p2486_p11 = scmp.ne.s32.totalorder %s3400_s27, %s2485_s21  ;;  %s2489_s30 = sshll.u32 %s2640_s6, 4  ;;  %s2490_s30 = int_to_ptr.vmem [resolvable:$false] %s2489_s30 }
 0x28f   : > { %s2491_s29 = scalar_lea.vmem %s2490_s30, 32  ;;  %p2492_p4 = scmp.lt.s32.totalorder %s3400_s27, %s2490_s30 }
 0x290   : > { %p2487_p13 = pnand %p2486_p11, %p3544_p5  ;;  %p2493_p6 = scmp.lt.s32.totalorder %s2491_s29, %s2485_s21 }
 0x292   : > { %p2488_p0 = pneg %p2487_p13  ;;  %p2494_p3 = por %p2493_p6, %p2492_p4 }
 0x294   : > { %p2495_p12 = pnand %p2494_p3, %p2488_p0 }
 0x296   : > { %2498 = shalt.err (!%p2495_p12)
}
 0x297   : > { %s2499_s13 = scalar_lea.hbm %s3396_s26, 16  ;;  %s2503_s22 = scalar_lea.hbm %s3546_s7, 32 }
 0x298   : > { %p2500_p10 = scmp.ne.s32.totalorder %s3396_s26, %s2499_s13  ;;  %p2504_p9 = scmp.lt.u32.totalorder %s3396_s26, %s3546_s7 }
 0x299   : > { %p2505_p8 = scmp.lt.u32.totalorder %s2503_s22, %s2499_s13  ;;  %p2507_p11 = scmp.lt.u32.totalorder %s2499_s13, %s3396_s26 }
 0x29a   : > { %p2501_p7 = pnand %p2500_p10, %p3544_p5 }
 0x29b   : > { %p2506_p1 = por %p2505_p8, %p2504_p9 }
 0x29c   : > { %p2502_p2 = pneg %p2501_p7 }
 0x29d   : > { %p2508_p13 = por %p2507_p11, %p2506_p1 }
 0x29f   : > { %p2509_p0 = pnand %p2508_p13, %p2502_p2 }
 0x2a1   : > { %2512 = shalt.err (!%p2509_p0)
}
 0x2a2   : > { %2161 = dma.vmem_to_hbm [thread:$0]  (%p3544_p5), %s3400_s27, 16, %s3396_s26, %s3406_s19  }
 0x2a3 PF: > { %s3547_s14 = sld [smem:[#allocation20_spill]]  ;;  %s3548_s0 = sld [smem:[#allocation29_spill]] }
 0x2a4   : > { %p2193_p4 = scmp.ge.s32.totalorder %s2623_s15, 2 }
 0x2a9   : > { %s1839_s16 = sand.u32 1, %s3547_s14   ;;  %p3549_p6 = scmp.ne.s32.totalorder %s3548_s0, 0 }
 0x2aa   : > { %s1840_s20 = scalar_lea.sflag [#allocation4], %s1839_s16 }
 0x2ab   : > { %p2174_p3 = pnand %p2193_p4, %p3549_p6 }
 0x2ad   : > { %2562 = dma.done.wait (!%p2174_p3), %s1840_s20, 64  }
 0x2ae   : > { %2564 = vsyncadd (!%p2174_p3), %s1840_s20, 4294967232  ;;  %s3550_s1 = sadd.s32 4294967294, %s2623_s15  }
 0x2af   : > { %s1848_s25 = sand.u32 1, %s3550_s1  }
 0x2b0   : > { %s1849_s23 = scalar_lea.sflag [#allocation7], %s1848_s25 }
 0x2b1   : > { %2566 = dma.done.wait (!%p2174_p3), %s1849_s23, 16  }
 0x2b2   : > { %2568 = vsyncadd (!%p2174_p3), %s1849_s23, 4294967280  ;;  %s3551_s17 = sld [smem:[#allocation30_spill]] }
 0x2b8   : > { %p3552_p12 = scmp.ne.s32.totalorder %s3551_s17, 0 }
 0x2ba   : > { %p2180_p5 = pnand %p2193_p4, %p3552_p12 }
 0x2bc   : > { %2570 = dma.done.wait (!%p2180_p5), %s1849_s23, 128  }
 0x2bd   : > { %2572 = vsyncadd (!%p2180_p5), %s1849_s23, 4294967168  ;;  %s1866_s27 = scalar_lea.sflag [#allocation10], %s1848_s25 }
 0x2be   : > { %2574 = dma.done.wait (!%p2174_p3), %s1866_s27, 80  }
 0x2bf   : > { %2576 = vsyncadd (!%p2174_p3), %s1866_s27, 4294967216  ;;  %s3553_s26 = sld [smem:[#allocation22_spill]] }
 0x2c5   : > { %s1882_s19 = sand.u32 1, %s3553_s26  }
 0x2c6   : > { %s1883_s21 = scalar_lea.sflag [#allocation13], %s1882_s19 }
 0x2c7   : > { %2578 = dma.done.wait (!%p2180_p5), %s1883_s21, 128  }
 0x2c8   : > { %2580 = vsyncadd (!%p2180_p5), %s1883_s21, 4294967168  ;;  %s34_s15 = sadd.s32 1, %s2623_s15   ;;  %s3554_s6 = sld [smem:[#allocation21_spill]] }
 0x2c9   : > { %p31_p10 = scmp.ge.s32.totalorder %s34_s15, 6   ;;  %s3555_s29 = sld [smem:[#allocation27_spill]] }
 0x2ca   : > { %s3556_s13 = sld [smem:[#allocation28_spill]]  ;;  %s3557_s11 = sld [smem:[#allocation23_spill]] }
 0x2cb   : > { %s3558_s12 = sld [smem:[#allocation24_spill]]  ;;  %s3559_s2 = sld [smem:[#allocation25_spill]] }
 0x2cc   : > { %s3560_s14 = sld [smem:[#allocation26_spill]]  ;;  %s3561_s27 = smov %s2587_s28 }
 0x2cd   : > { %s3563_s30 = smov %s2599_s9  ;;  %s3564_s9 = smov %s2603_s10 }
 0x2ce   : > { %s3562_s28 = smov %s3554_s6  ;;  %33 = sbr.rel (!%p31_p10) target bundleno = 21 (0x15), region = 165 }
 0x2d0   : > { %s3565_s10 = smov %s3556_s13 }
 0x2d1   : > { %s3566_s13 = smov %s3559_s2 }
 0x2d5   :  { %1888 = vsyncpa [#allocation3], 1 }
 0x2d6   :  { %1890 = vsyncpa [#allocation3 + $0x1], 1 }
 0x2d7   :  { %1891 = vsyncpa [#allocation4], 1 }
 0x2d8   :  { %1893 = vsyncpa [#allocation4 + $0x1], 1 }
 0x2d9   :  { %1894 = vsyncpa [#allocation7], 1 }
 0x2da   :  { %1896 = vsyncpa [#allocation7 + $0x1], 1 }
 0x2db   :  { %1897 = vsyncpa [#allocation10], 1 }
 0x2dc   :  { %1899 = vsyncpa [#allocation10 + $0x1], 1 }
 0x2dd   :  { %1900 = vsyncpa [#allocation13], 1 }
 0x2de   :  { %1902 = vsyncpa [#allocation13 + $0x1], 1 }

</bundles_post_ra>
